<compile_context>
chip_gen: v7x
topology: tpu7x:2x2x1
jax: 0.10.0
libtpu: 0.0.40
codegen_flags: <defaults>
</compile_context>

<pallas_src>
import jax
import jax.numpy as jnp
from jax.experimental import pallas as pl
from jax.experimental.pallas import tpu as pltpu

BIDIRECTIONAL = False
DROPOUT = 0.0
HIDDEN_SIZE = 32
INPUT_SIZE = 16
NUM_LAYERS = 2
OUTPUT_SIZE = 4


# ----------------------------------------------------------------------------
# Fused kernel: wavefront 2-layer GRU recurrence + Linear head, all in VMEM.
# Gate order follows PyTorch: [r, z, n] along the 3*H axis.
# ----------------------------------------------------------------------------
def _gru_fused_kernel(x_ref, h0_ref, wih0_ref, bih0_ref, wstep_ref,
                      wfc_ref, bfc_ref, preds_ref, hfin_ref):
    L, B, H = h0_ref.shape
    T = x_ref.shape[0] // B
    H2, H3 = 2 * H, 3 * H
    GP = wstep_ref.shape[1] // 3          # lane stride of each packed gate block

    def cell(gi, gh, h_prev):
        # gi already includes b_ih; gh already includes b_hh (ones-column fold).
        rz = jax.nn.sigmoid(gi[:, :H2] + gh[:, :H2])   # one EUP push for r and z
        r, z = rz[:, :H], rz[:, H:]
        n = jnp.tanh(gi[:, H2:] + r * gh[:, H2:])
        return n + z * (h_prev - n)                    # == (1 - z) * n + z * h_prev

    # Layer-0 input projection hoisted out of the recurrence: one MXU matmul
    # over all timesteps (time-major rows: t*B + b).
    gi0_all = (jnp.dot(x_ref[...], wih0_ref[...],
                       preferred_element_type=jnp.float32)
               + bih0_ref[...])                        # (T*B, 3H)

    wstep = wstep_ref[...]                             # (2H+1, 3*GP)
    ones = jnp.ones((B, 1), jnp.float32)
    h0 = h0_ref[0].astype(jnp.float32)                 # layer-0 hidden state
    h1 = h0_ref[1].astype(jnp.float32)                 # layer-1 hidden state

    # Wavefront: step s runs layer-0 at t=s and layer-1 at t=s-1.
    for s in range(T + 1):                             # static unroll (T+1 steps)
        # One fused MXU push: [gh0 | gi1 | gh1] from [h0 | h1 | 1].
        g = jnp.dot(jnp.concatenate([h0, h1, ones], axis=-1), wstep,
                    preferred_element_type=jnp.float32)          # (B, 3*GP)
        gh0 = g[:, 0:H3]                       # h0 @ W_hh0^T + b_hh0
        gi1 = g[:, GP:GP + H3]                 # h0 @ W_ih1^T + b_ih1  (layer-1 input)
        gh1 = g[:, 2 * GP:2 * GP + H3]         # h1 @ W_hh1^T + b_hh1
        if s < T:                              # layer-0 cell at time t = s
            h0 = cell(gi0_all[s * B:(s + 1) * B, :], gh0, h0)
        if s >= 1:                             # layer-1 cell at time t = s - 1
            h1 = cell(gi1, gh1, h1)

    # fc head on o[:, -1, :] == final layer-1 hidden.
    preds_ref[...] = (jnp.dot(h1, wfc_ref[...],
                              preferred_element_type=jnp.float32)
                      + bfc_ref[...]).astype(preds_ref.dtype)
    hfin_ref[0] = h0.astype(hfin_ref.dtype)
    hfin_ref[1] = h1.astype(hfin_ref.dtype)


# ----------------------------------------------------------------------------
# Full module forward:  (preds, h_final) = GRU(x, h)
# ----------------------------------------------------------------------------
def gru_forward(params, x_bti, h0_lbh):
    """x_bti: [B, T, I] (batch_first), h0_lbh: [NUM_LAYERS, B, H]."""
    assert NUM_LAYERS == 2  # kernel specialized to the 2-layer stack
    B, T, I = x_bti.shape
    H = HIDDEN_SIZE
    L = NUM_LAYERS
    GP = 4 * H                           # per gate-block lane stride (128 for H=32)
    p0, p1 = params["gru"]

    # Time-major flat view of x (row = t*B + b): pure layout plumbing so the
    # per-step gi0 slice in the kernel is a contiguous sublane slice.
    x_tb = jnp.transpose(x_bti.astype(jnp.float32), (1, 0, 2)).reshape(T * B, I)

    # Packed wavefront-step weight: [h0 | h1 | 1] @ W -> [gh0 |pad| gi1 |pad| gh1 |pad]
    zH = jnp.zeros((H, 3 * H), jnp.float32)
    blk_gh0 = jnp.concatenate([p0["w_hh_t"], zH, p0["b_hh"]], axis=0)   # (2H+1, 3H)
    blk_gi1 = jnp.concatenate([p1["w_ih_t"], zH, p1["b_ih"]], axis=0)   # (2H+1, 3H)
    blk_gh1 = jnp.concatenate([zH, p1["w_hh_t"], p1["b_hh"]], axis=0)   # (2H+1, 3H)
    padc = jnp.zeros((2 * H + 1, GP - 3 * H), jnp.float32)
    w_step = jnp.concatenate([blk_gh0, padc, blk_gi1, padc, blk_gh1, padc],
                             axis=1)                                    # (2H+1, 3*GP)

    grid_spec = pltpu.PrefetchScalarGridSpec(
        num_scalar_prefetch=0,
        grid=(1,),
        in_specs=[
            pl.BlockSpec((T * B, I), lambda i: (0, 0)),            # x (time-major)
            pl.BlockSpec((L, B, H), lambda i: (0, 0, 0)),          # h0
            pl.BlockSpec((I, 3 * H), lambda i: (0, 0)),            # W_ih^T layer0
            pl.BlockSpec((1, 3 * H), lambda i: (0, 0)),            # b_ih   layer0
            pl.BlockSpec((2 * H + 1, 3 * GP), lambda i: (0, 0)),   # packed step W
            pl.BlockSpec((H, OUTPUT_SIZE), lambda i: (0, 0)),      # fc W^T
            pl.BlockSpec((1, OUTPUT_SIZE), lambda i: (0, 0)),      # fc b
        ],
        out_specs=[
            pl.BlockSpec((B, OUTPUT_SIZE), lambda i: (0, 0)),      # preds
            pl.BlockSpec((L, B, H), lambda i: (0, 0, 0)),          # h_final
        ],
    )
    preds, h_final = pl.pallas_call(
        _gru_fused_kernel,
        out_shape=(jax.ShapeDtypeStruct((B, OUTPUT_SIZE), jnp.float32),
                   jax.ShapeDtypeStruct((L, B, H), jnp.float32)),
        grid_spec=grid_spec,
        compiler_params=pltpu.CompilerParams(
            dimension_semantics=("arbitrary",)),
    )(x_tb, h0_lbh.astype(jnp.float32),
      p0["w_ih_t"], p0["b_ih"], w_step,
      params["fc"]["w_t"], params["fc"]["b"])
    return preds, h_final


# ----------------------------------------------------------------------------
# Pure-JAX reference (for correctness check).
# ----------------------------------------------------------------------------
def gru_forward_ref(params, x_bti, h0_lbh):
    B, T, _ = x_bti.shape
    H = HIDDEN_SIZE
    layer_in = x_bti.astype(jnp.float32)
    h_finals = []
    for l in range(NUM_LAYERS):
        p = params["gru"][l]
        h = h0_lbh[l].astype(jnp.float32)
        outs = []
        for t in range(T):
            x_t = layer_in[:, t, :]
            gi = x_t @ p["w_ih_t"] + p["b_ih"]
            gh = h @ p["w_hh_t"] + p["b_hh"]
            r = jax.nn.sigmoid(gi[:, :H] + gh[:, :H])
            z = jax.nn.sigmoid(gi[:, H:2 * H] + gh[:, H:2 * H])
            n = jnp.tanh(gi[:, 2 * H:] + r * gh[:, 2 * H:])
            h = (1.0 - z) * n + z * h
            outs.append(h)
        layer_in = jnp.stack(outs, axis=1)
        h_finals.append(h)
    preds = layer_in[:, -1, :] @ params["fc"]["w_t"] + params["fc"]["b"]
    return preds, jnp.stack(h_finals, axis=0)


def init_params(key):
    """Deterministic param init (uniform +-1/sqrt(H), like PyTorch's default)."""
    params = {"gru": [], "fc": {}}
    bound = 1.0 / (HIDDEN_SIZE ** 0.5)
    for l in range(NUM_LAYERS):
        in_dim = INPUT_SIZE if l == 0 else HIDDEN_SIZE
        key, k1, k2, k3, k4 = jax.random.split(key, 5)
        params["gru"].append({
            # stored pre-transposed: [in, 3H] so kernels do x @ W
            "w_ih_t": jax.random.uniform(k1, (in_dim, 3 * HIDDEN_SIZE),
                                         jnp.float32, -bound, bound),
            "w_hh_t": jax.random.uniform(k2, (HIDDEN_SIZE, 3 * HIDDEN_SIZE),
                                         jnp.float32, -bound, bound),
            "b_ih": jax.random.uniform(k3, (1, 3 * HIDDEN_SIZE),
                                       jnp.float32, -bound, bound),
            "b_hh": jax.random.uniform(k4, (1, 3 * HIDDEN_SIZE),
                                       jnp.float32, -bound, bound),
        })
    key, k1, k2 = jax.random.split(key, 3)
    fc_bound = 1.0 / (HIDDEN_SIZE ** 0.5)
    params["fc"]["w_t"] = jax.random.uniform(
        k1, (HIDDEN_SIZE, OUTPUT_SIZE), jnp.float32, -fc_bound, fc_bound)
    params["fc"]["b"] = jax.random.uniform(
        k2, (1, OUTPUT_SIZE), jnp.float32, -fc_bound, fc_bound)
    return params


if __name__ == "__main__":
    B, T = 2, 8
    key = jax.random.PRNGKey(0)
    kp, kx = jax.random.split(key)
    params = init_params(kp)

    x = jax.random.normal(kx, (B, T, INPUT_SIZE), jnp.float32)   # [B, T, I]
    h0 = jnp.zeros((NUM_LAYERS, B, HIDDEN_SIZE), jnp.float32)    # init_state()

    preds, h_final = jax.block_until_ready(gru_forward(params, x, h0))

    preds_ref, h_ref = gru_forward_ref(params, x, h0)
    assert preds.shape == (B, OUTPUT_SIZE)
    assert h_final.shape == (NUM_LAYERS, B, HIDDEN_SIZE)
    assert jnp.allclose(preds, preds_ref, atol=1e-5, rtol=1e-5)
    assert jnp.allclose(h_final, h_ref, atol=1e-5, rtol=1e-5)

    print("KERNEL_OK")
</pallas_src>

<mosaic_0001>
module attributes {stable_mosaic.version = 11 : i64} {
  func.func @_gru_fused_kernel(%arg0: i32, %arg1: memref<16x16xf32, #tpu.memory_space<vmem>>, %arg2: memref<2x2x32xf32, #tpu.memory_space<vmem>>, %arg3: memref<16x96xf32, #tpu.memory_space<vmem>>, %arg4: memref<1x96xf32, #tpu.memory_space<vmem>>, %arg5: memref<65x384xf32, #tpu.memory_space<vmem>>, %arg6: memref<32x4xf32, #tpu.memory_space<vmem>>, %arg7: memref<1x4xf32, #tpu.memory_space<vmem>>, %arg8: memref<2x4xf32, #tpu.memory_space<vmem>>, %arg9: memref<2x2x32xf32, #tpu.memory_space<vmem>>) attributes {dimension_semantics = [#tpu.dimension_semantics<arbitrary>], iteration_bounds = array<i64: 1>, scalar_prefetch = 0 : i64, scratch_operands = 0 : i64, tpu.core_type = #tpu.core_type<tc>, window_params = [{pipeline_mode = #tpu.pipeline_mode<synchronous>, transform_indices = @transform_0, window_bounds = array<i64: 16, 16>}, {pipeline_mode = #tpu.pipeline_mode<synchronous>, transform_indices = @transform_1, window_bounds = array<i64: 2, 2, 32>}, {pipeline_mode = #tpu.pipeline_mode<synchronous>, transform_indices = @transform_2, window_bounds = array<i64: 16, 96>}, {pipeline_mode = #tpu.pipeline_mode<synchronous>, transform_indices = @transform_3, window_bounds = array<i64: 1, 96>}, {pipeline_mode = #tpu.pipeline_mode<synchronous>, transform_indices = @transform_4, window_bounds = array<i64: 65, 384>}, {pipeline_mode = #tpu.pipeline_mode<synchronous>, transform_indices = @transform_5, window_bounds = array<i64: 32, 4>}, {pipeline_mode = #tpu.pipeline_mode<synchronous>, transform_indices = @transform_6, window_bounds = array<i64: 1, 4>}, {pipeline_mode = #tpu.pipeline_mode<synchronous>, transform_indices = @transform_7, window_bounds = array<i64: 2, 4>}, {pipeline_mode = #tpu.pipeline_mode<synchronous>, transform_indices = @transform_8, window_bounds = array<i64: 2, 2, 32>}]} {
    %c0 = arith.constant 0 : index
    %c0_0 = arith.constant 0 : index
    %0 = vector.load %arg1[%c0, %c0_0] : memref<16x16xf32, #tpu.memory_space<vmem>>, vector<16x16xf32>
    %c0_1 = arith.constant 0 : index
    %c0_2 = arith.constant 0 : index
    %1 = vector.load %arg3[%c0_1, %c0_2] : memref<16x96xf32, #tpu.memory_space<vmem>>, vector<16x96xf32>
    %cst = arith.constant dense<0.000000e+00> : vector<16x96xf32>
    %2 = tpu.matmul %0, %1, %cst {dimension_numbers = #tpu.dot_dimension_numbers<[1], [0], [0], [1], [0, 0, 1, 1], [], []>} : vector<16x16xf32>, vector<16x96xf32>, vector<16x96xf32> -> vector<16x96xf32>
    %c0_3 = arith.constant 0 : index
    %c0_4 = arith.constant 0 : index
    %3 = vector.load %arg4[%c0_3, %c0_4] : memref<1x96xf32, #tpu.memory_space<vmem>>, vector<1x96xf32>
    %4 = vector.broadcast %3 : vector<1x96xf32> to vector<16x96xf32>
    %5 = arith.addf %2, %4 : vector<16x96xf32>
    %c0_5 = arith.constant 0 : index
    %c0_6 = arith.constant 0 : index
    %6 = vector.load %arg5[%c0_5, %c0_6] : memref<65x384xf32, #tpu.memory_space<vmem>>, vector<65x384xf32>
    %cst_7 = arith.constant 1.000000e+00 : f32
    %7 = vector.broadcast %cst_7 : f32 to vector<2x1xf32>
    %c0_8 = arith.constant 0 : index
    %c0_9 = arith.constant 0 : index
    %c0_10 = arith.constant 0 : index
    %8 = vector.load %arg2[%c0_8, %c0_9, %c0_10] : memref<2x2x32xf32, #tpu.memory_space<vmem>>, vector<1x2x32xf32>
    %9 = vector.shape_cast %8 : vector<1x2x32xf32> to vector<2x32xf32>
    %c1 = arith.constant 1 : index
    %c0_11 = arith.constant 0 : index
    %c0_12 = arith.constant 0 : index
    %10 = vector.load %arg2[%c1, %c0_11, %c0_12] : memref<2x2x32xf32, #tpu.memory_space<vmem>>, vector<1x2x32xf32>
    %11 = vector.shape_cast %10 : vector<1x2x32xf32> to vector<2x32xf32>
    %12 = tpu.concatenate %9, %11, %7 in 1 : vector<2x32xf32>, vector<2x32xf32>, vector<2x1xf32> -> vector<2x65xf32>
    %cst_13 = arith.constant dense<0.000000e+00> : vector<2x384xf32>
    %13 = tpu.matmul %12, %6, %cst_13 {dimension_numbers = #tpu.dot_dimension_numbers<[1], [0], [0], [1], [0, 0, 1, 1], [], []>} : vector<2x65xf32>, vector<65x384xf32>, vector<2x384xf32> -> vector<2x384xf32>
    %14 = vector.extract_strided_slice %13 {offsets = [0, 0], sizes = [2, 96], strides = [1, 1]} : vector<2x384xf32> to vector<2x96xf32>
    %15 = vector.extract_strided_slice %5 {offsets = [0, 0], sizes = [2, 96], strides = [1, 1]} : vector<16x96xf32> to vector<2x96xf32>
    %16 = vector.extract_strided_slice %15 {offsets = [0, 0], sizes = [2, 64], strides = [1, 1]} : vector<2x96xf32> to vector<2x64xf32>
    %17 = vector.extract_strided_slice %14 {offsets = [0, 0], sizes = [2, 64], strides = [1, 1]} : vector<2x96xf32> to vector<2x64xf32>
    %18 = arith.addf %16, %17 : vector<2x64xf32>
    %19 = arith.negf %18 : vector<2x64xf32>
    %20 = math.exp %19 : vector<2x64xf32>
    %cst_14 = arith.constant 1.000000e+00 : f32
    %21 = vector.broadcast %cst_14 : f32 to vector<2x64xf32>
    %22 = arith.addf %21, %20 : vector<2x64xf32>
    %23 = arith.divf %21, %22 : vector<2x64xf32>
    %24 = vector.extract_strided_slice %23 {offsets = [0, 0], sizes = [2, 32], strides = [1, 1]} : vector<2x64xf32> to vector<2x32xf32>
    %25 = vector.extract_strided_slice %23 {offsets = [0, 32], sizes = [2, 32], strides = [1, 1]} : vector<2x64xf32> to vector<2x32xf32>
    %26 = vector.extract_strided_slice %15 {offsets = [0, 64], sizes = [2, 32], strides = [1, 1]} : vector<2x96xf32> to vector<2x32xf32>
    %27 = vector.extract_strided_slice %14 {offsets = [0, 64], sizes = [2, 32], strides = [1, 1]} : vector<2x96xf32> to vector<2x32xf32>
    %28 = arith.mulf %24, %27 : vector<2x32xf32>
    %29 = arith.addf %26, %28 : vector<2x32xf32>
    %30 = math.tanh %29 : vector<2x32xf32>
    %31 = arith.subf %9, %30 : vector<2x32xf32>
    %32 = arith.mulf %25, %31 : vector<2x32xf32>
    %33 = arith.addf %30, %32 : vector<2x32xf32>
    %34 = tpu.concatenate %33, %11, %7 in 1 : vector<2x32xf32>, vector<2x32xf32>, vector<2x1xf32> -> vector<2x65xf32>
    %cst_15 = arith.constant dense<0.000000e+00> : vector<2x384xf32>
    %35 = tpu.matmul %34, %6, %cst_15 {dimension_numbers = #tpu.dot_dimension_numbers<[1], [0], [0], [1], [0, 0, 1, 1], [], []>} : vector<2x65xf32>, vector<65x384xf32>, vector<2x384xf32> -> vector<2x384xf32>
    %36 = vector.extract_strided_slice %35 {offsets = [0, 0], sizes = [2, 96], strides = [1, 1]} : vector<2x384xf32> to vector<2x96xf32>
    %37 = vector.extract_strided_slice %35 {offsets = [0, 128], sizes = [2, 96], strides = [1, 1]} : vector<2x384xf32> to vector<2x96xf32>
    %38 = vector.extract_strided_slice %35 {offsets = [0, 256], sizes = [2, 96], strides = [1, 1]} : vector<2x384xf32> to vector<2x96xf32>
    %39 = vector.extract_strided_slice %5 {offsets = [2, 0], sizes = [2, 96], strides = [1, 1]} : vector<16x96xf32> to vector<2x96xf32>
    %40 = vector.extract_strided_slice %39 {offsets = [0, 0], sizes = [2, 64], strides = [1, 1]} : vector<2x96xf32> to vector<2x64xf32>
    %41 = vector.extract_strided_slice %36 {offsets = [0, 0], sizes = [2, 64], strides = [1, 1]} : vector<2x96xf32> to vector<2x64xf32>
    %42 = arith.addf %40, %41 : vector<2x64xf32>
    %43 = arith.negf %42 : vector<2x64xf32>
    %44 = math.exp %43 : vector<2x64xf32>
    %cst_16 = arith.constant 1.000000e+00 : f32
    %45 = vector.broadcast %cst_16 : f32 to vector<2x64xf32>
    %46 = arith.addf %45, %44 : vector<2x64xf32>
    %47 = arith.divf %45, %46 : vector<2x64xf32>
    %48 = vector.extract_strided_slice %47 {offsets = [0, 0], sizes = [2, 32], strides = [1, 1]} : vector<2x64xf32> to vector<2x32xf32>
    %49 = vector.extract_strided_slice %47 {offsets = [0, 32], sizes = [2, 32], strides = [1, 1]} : vector<2x64xf32> to vector<2x32xf32>
    %50 = vector.extract_strided_slice %39 {offsets = [0, 64], sizes = [2, 32], strides = [1, 1]} : vector<2x96xf32> to vector<2x32xf32>
    %51 = vector.extract_strided_slice %36 {offsets = [0, 64], sizes = [2, 32], strides = [1, 1]} : vector<2x96xf32> to vector<2x32xf32>
    %52 = arith.mulf %48, %51 : vector<2x32xf32>
    %53 = arith.addf %50, %52 : vector<2x32xf32>
    %54 = math.tanh %53 : vector<2x32xf32>
    %55 = arith.subf %33, %54 : vector<2x32xf32>
    %56 = arith.mulf %49, %55 : vector<2x32xf32>
    %57 = arith.addf %54, %56 : vector<2x32xf32>
    %58 = vector.extract_strided_slice %37 {offsets = [0, 0], sizes = [2, 64], strides = [1, 1]} : vector<2x96xf32> to vector<2x64xf32>
    %59 = vector.extract_strided_slice %38 {offsets = [0, 0], sizes = [2, 64], strides = [1, 1]} : vector<2x96xf32> to vector<2x64xf32>
    %60 = arith.addf %58, %59 : vector<2x64xf32>
    %61 = arith.negf %60 : vector<2x64xf32>
    %62 = math.exp %61 : vector<2x64xf32>
    %cst_17 = arith.constant 1.000000e+00 : f32
    %63 = vector.broadcast %cst_17 : f32 to vector<2x64xf32>
    %64 = arith.addf %63, %62 : vector<2x64xf32>
    %65 = arith.divf %63, %64 : vector<2x64xf32>
    %66 = vector.extract_strided_slice %65 {offsets = [0, 0], sizes = [2, 32], strides = [1, 1]} : vector<2x64xf32> to vector<2x32xf32>
    %67 = vector.extract_strided_slice %65 {offsets = [0, 32], sizes = [2, 32], strides = [1, 1]} : vector<2x64xf32> to vector<2x32xf32>
    %68 = vector.extract_strided_slice %37 {offsets = [0, 64], sizes = [2, 32], strides = [1, 1]} : vector<2x96xf32> to vector<2x32xf32>
    %69 = vector.extract_strided_slice %38 {offsets = [0, 64], sizes = [2, 32], strides = [1, 1]} : vector<2x96xf32> to vector<2x32xf32>
    %70 = arith.mulf %66, %69 : vector<2x32xf32>
    %71 = arith.addf %68, %70 : vector<2x32xf32>
    %72 = math.tanh %71 : vector<2x32xf32>
    %73 = arith.subf %11, %72 : vector<2x32xf32>
    %74 = arith.mulf %67, %73 : vector<2x32xf32>
    %75 = arith.addf %72, %74 : vector<2x32xf32>
    %76 = tpu.concatenate %57, %75, %7 in 1 : vector<2x32xf32>, vector<2x32xf32>, vector<2x1xf32> -> vector<2x65xf32>
    %cst_18 = arith.constant dense<0.000000e+00> : vector<2x384xf32>
    %77 = tpu.matmul %76, %6, %cst_18 {dimension_numbers = #tpu.dot_dimension_numbers<[1], [0], [0], [1], [0, 0, 1, 1], [], []>} : vector<2x65xf32>, vector<65x384xf32>, vector<2x384xf32> -> vector<2x384xf32>
    %78 = vector.extract_strided_slice %77 {offsets = [0, 0], sizes = [2, 96], strides = [1, 1]} : vector<2x384xf32> to vector<2x96xf32>
    %79 = vector.extract_strided_slice %77 {offsets = [0, 128], sizes = [2, 96], strides = [1, 1]} : vector<2x384xf32> to vector<2x96xf32>
    %80 = vector.extract_strided_slice %77 {offsets = [0, 256], sizes = [2, 96], strides = [1, 1]} : vector<2x384xf32> to vector<2x96xf32>
    %81 = vector.extract_strided_slice %5 {offsets = [4, 0], sizes = [2, 96], strides = [1, 1]} : vector<16x96xf32> to vector<2x96xf32>
    %82 = vector.extract_strided_slice %81 {offsets = [0, 0], sizes = [2, 64], strides = [1, 1]} : vector<2x96xf32> to vector<2x64xf32>
    %83 = vector.extract_strided_slice %78 {offsets = [0, 0], sizes = [2, 64], strides = [1, 1]} : vector<2x96xf32> to vector<2x64xf32>
    %84 = arith.addf %82, %83 : vector<2x64xf32>
    %85 = arith.negf %84 : vector<2x64xf32>
    %86 = math.exp %85 : vector<2x64xf32>
    %cst_19 = arith.constant 1.000000e+00 : f32
    %87 = vector.broadcast %cst_19 : f32 to vector<2x64xf32>
    %88 = arith.addf %87, %86 : vector<2x64xf32>
    %89 = arith.divf %87, %88 : vector<2x64xf32>
    %90 = vector.extract_strided_slice %89 {offsets = [0, 0], sizes = [2, 32], strides = [1, 1]} : vector<2x64xf32> to vector<2x32xf32>
    %91 = vector.extract_strided_slice %89 {offsets = [0, 32], sizes = [2, 32], strides = [1, 1]} : vector<2x64xf32> to vector<2x32xf32>
    %92 = vector.extract_strided_slice %81 {offsets = [0, 64], sizes = [2, 32], strides = [1, 1]} : vector<2x96xf32> to vector<2x32xf32>
    %93 = vector.extract_strided_slice %78 {offsets = [0, 64], sizes = [2, 32], strides = [1, 1]} : vector<2x96xf32> to vector<2x32xf32>
    %94 = arith.mulf %90, %93 : vector<2x32xf32>
    %95 = arith.addf %92, %94 : vector<2x32xf32>
    %96 = math.tanh %95 : vector<2x32xf32>
    %97 = arith.subf %57, %96 : vector<2x32xf32>
    %98 = arith.mulf %91, %97 : vector<2x32xf32>
    %99 = arith.addf %96, %98 : vector<2x32xf32>
    %100 = vector.extract_strided_slice %79 {offsets = [0, 0], sizes = [2, 64], strides = [1, 1]} : vector<2x96xf32> to vector<2x64xf32>
    %101 = vector.extract_strided_slice %80 {offsets = [0, 0], sizes = [2, 64], strides = [1, 1]} : vector<2x96xf32> to vector<2x64xf32>
    %102 = arith.addf %100, %101 : vector<2x64xf32>
    %103 = arith.negf %102 : vector<2x64xf32>
    %104 = math.exp %103 : vector<2x64xf32>
    %cst_20 = arith.constant 1.000000e+00 : f32
    %105 = vector.broadcast %cst_20 : f32 to vector<2x64xf32>
    %106 = arith.addf %105, %104 : vector<2x64xf32>
    %107 = arith.divf %105, %106 : vector<2x64xf32>
    %108 = vector.extract_strided_slice %107 {offsets = [0, 0], sizes = [2, 32], strides = [1, 1]} : vector<2x64xf32> to vector<2x32xf32>
    %109 = vector.extract_strided_slice %107 {offsets = [0, 32], sizes = [2, 32], strides = [1, 1]} : vector<2x64xf32> to vector<2x32xf32>
    %110 = vector.extract_strided_slice %79 {offsets = [0, 64], sizes = [2, 32], strides = [1, 1]} : vector<2x96xf32> to vector<2x32xf32>
    %111 = vector.extract_strided_slice %80 {offsets = [0, 64], sizes = [2, 32], strides = [1, 1]} : vector<2x96xf32> to vector<2x32xf32>
    %112 = arith.mulf %108, %111 : vector<2x32xf32>
    %113 = arith.addf %110, %112 : vector<2x32xf32>
    %114 = math.tanh %113 : vector<2x32xf32>
    %115 = arith.subf %75, %114 : vector<2x32xf32>
    %116 = arith.mulf %109, %115 : vector<2x32xf32>
    %117 = arith.addf %114, %116 : vector<2x32xf32>
    %118 = tpu.concatenate %99, %117, %7 in 1 : vector<2x32xf32>, vector<2x32xf32>, vector<2x1xf32> -> vector<2x65xf32>
    %cst_21 = arith.constant dense<0.000000e+00> : vector<2x384xf32>
    %119 = tpu.matmul %118, %6, %cst_21 {dimension_numbers = #tpu.dot_dimension_numbers<[1], [0], [0], [1], [0, 0, 1, 1], [], []>} : vector<2x65xf32>, vector<65x384xf32>, vector<2x384xf32> -> vector<2x384xf32>
    %120 = vector.extract_strided_slice %119 {offsets = [0, 0], sizes = [2, 96], strides = [1, 1]} : vector<2x384xf32> to vector<2x96xf32>
    %121 = vector.extract_strided_slice %119 {offsets = [0, 128], sizes = [2, 96], strides = [1, 1]} : vector<2x384xf32> to vector<2x96xf32>
    %122 = vector.extract_strided_slice %119 {offsets = [0, 256], sizes = [2, 96], strides = [1, 1]} : vector<2x384xf32> to vector<2x96xf32>
    %123 = vector.extract_strided_slice %5 {offsets = [6, 0], sizes = [2, 96], strides = [1, 1]} : vector<16x96xf32> to vector<2x96xf32>
    %124 = vector.extract_strided_slice %123 {offsets = [0, 0], sizes = [2, 64], strides = [1, 1]} : vector<2x96xf32> to vector<2x64xf32>
    %125 = vector.extract_strided_slice %120 {offsets = [0, 0], sizes = [2, 64], strides = [1, 1]} : vector<2x96xf32> to vector<2x64xf32>
    %126 = arith.addf %124, %125 : vector<2x64xf32>
    %127 = arith.negf %126 : vector<2x64xf32>
    %128 = math.exp %127 : vector<2x64xf32>
    %cst_22 = arith.constant 1.000000e+00 : f32
    %129 = vector.broadcast %cst_22 : f32 to vector<2x64xf32>
    %130 = arith.addf %129, %128 : vector<2x64xf32>
    %131 = arith.divf %129, %130 : vector<2x64xf32>
    %132 = vector.extract_strided_slice %131 {offsets = [0, 0], sizes = [2, 32], strides = [1, 1]} : vector<2x64xf32> to vector<2x32xf32>
    %133 = vector.extract_strided_slice %131 {offsets = [0, 32], sizes = [2, 32], strides = [1, 1]} : vector<2x64xf32> to vector<2x32xf32>
    %134 = vector.extract_strided_slice %123 {offsets = [0, 64], sizes = [2, 32], strides = [1, 1]} : vector<2x96xf32> to vector<2x32xf32>
    %135 = vector.extract_strided_slice %120 {offsets = [0, 64], sizes = [2, 32], strides = [1, 1]} : vector<2x96xf32> to vector<2x32xf32>
    %136 = arith.mulf %132, %135 : vector<2x32xf32>
    %137 = arith.addf %134, %136 : vector<2x32xf32>
    %138 = math.tanh %137 : vector<2x32xf32>
    %139 = arith.subf %99, %138 : vector<2x32xf32>
    %140 = arith.mulf %133, %139 : vector<2x32xf32>
    %141 = arith.addf %138, %140 : vector<2x32xf32>
    %142 = vector.extract_strided_slice %121 {offsets = [0, 0], sizes = [2, 64], strides = [1, 1]} : vector<2x96xf32> to vector<2x64xf32>
    %143 = vector.extract_strided_slice %122 {offsets = [0, 0], sizes = [2, 64], strides = [1, 1]} : vector<2x96xf32> to vector<2x64xf32>
    %144 = arith.addf %142, %143 : vector<2x64xf32>
    %145 = arith.negf %144 : vector<2x64xf32>
    %146 = math.exp %145 : vector<2x64xf32>
    %cst_23 = arith.constant 1.000000e+00 : f32
    %147 = vector.broadcast %cst_23 : f32 to vector<2x64xf32>
    %148 = arith.addf %147, %146 : vector<2x64xf32>
    %149 = arith.divf %147, %148 : vector<2x64xf32>
    %150 = vector.extract_strided_slice %149 {offsets = [0, 0], sizes = [2, 32], strides = [1, 1]} : vector<2x64xf32> to vector<2x32xf32>
    %151 = vector.extract_strided_slice %149 {offsets = [0, 32], sizes = [2, 32], strides = [1, 1]} : vector<2x64xf32> to vector<2x32xf32>
    %152 = vector.extract_strided_slice %121 {offsets = [0, 64], sizes = [2, 32], strides = [1, 1]} : vector<2x96xf32> to vector<2x32xf32>
    %153 = vector.extract_strided_slice %122 {offsets = [0, 64], sizes = [2, 32], strides = [1, 1]} : vector<2x96xf32> to vector<2x32xf32>
    %154 = arith.mulf %150, %153 : vector<2x32xf32>
    %155 = arith.addf %152, %154 : vector<2x32xf32>
    %156 = math.tanh %155 : vector<2x32xf32>
    %157 = arith.subf %117, %156 : vector<2x32xf32>
    %158 = arith.mulf %151, %157 : vector<2x32xf32>
    %159 = arith.addf %156, %158 : vector<2x32xf32>
    %160 = tpu.concatenate %141, %159, %7 in 1 : vector<2x32xf32>, vector<2x32xf32>, vector<2x1xf32> -> vector<2x65xf32>
    %cst_24 = arith.constant dense<0.000000e+00> : vector<2x384xf32>
    %161 = tpu.matmul %160, %6, %cst_24 {dimension_numbers = #tpu.dot_dimension_numbers<[1], [0], [0], [1], [0, 0, 1, 1], [], []>} : vector<2x65xf32>, vector<65x384xf32>, vector<2x384xf32> -> vector<2x384xf32>
    %162 = vector.extract_strided_slice %161 {offsets = [0, 0], sizes = [2, 96], strides = [1, 1]} : vector<2x384xf32> to vector<2x96xf32>
    %163 = vector.extract_strided_slice %161 {offsets = [0, 128], sizes = [2, 96], strides = [1, 1]} : vector<2x384xf32> to vector<2x96xf32>
    %164 = vector.extract_strided_slice %161 {offsets = [0, 256], sizes = [2, 96], strides = [1, 1]} : vector<2x384xf32> to vector<2x96xf32>
    %165 = vector.extract_strided_slice %5 {offsets = [8, 0], sizes = [2, 96], strides = [1, 1]} : vector<16x96xf32> to vector<2x96xf32>
    %166 = vector.extract_strided_slice %165 {offsets = [0, 0], sizes = [2, 64], strides = [1, 1]} : vector<2x96xf32> to vector<2x64xf32>
    %167 = vector.extract_strided_slice %162 {offsets = [0, 0], sizes = [2, 64], strides = [1, 1]} : vector<2x96xf32> to vector<2x64xf32>
    %168 = arith.addf %166, %167 : vector<2x64xf32>
    %169 = arith.negf %168 : vector<2x64xf32>
    %170 = math.exp %169 : vector<2x64xf32>
    %cst_25 = arith.constant 1.000000e+00 : f32
    %171 = vector.broadcast %cst_25 : f32 to vector<2x64xf32>
    %172 = arith.addf %171, %170 : vector<2x64xf32>
    %173 = arith.divf %171, %172 : vector<2x64xf32>
    %174 = vector.extract_strided_slice %173 {offsets = [0, 0], sizes = [2, 32], strides = [1, 1]} : vector<2x64xf32> to vector<2x32xf32>
    %175 = vector.extract_strided_slice %173 {offsets = [0, 32], sizes = [2, 32], strides = [1, 1]} : vector<2x64xf32> to vector<2x32xf32>
    %176 = vector.extract_strided_slice %165 {offsets = [0, 64], sizes = [2, 32], strides = [1, 1]} : vector<2x96xf32> to vector<2x32xf32>
    %177 = vector.extract_strided_slice %162 {offsets = [0, 64], sizes = [2, 32], strides = [1, 1]} : vector<2x96xf32> to vector<2x32xf32>
    %178 = arith.mulf %174, %177 : vector<2x32xf32>
    %179 = arith.addf %176, %178 : vector<2x32xf32>
    %180 = math.tanh %179 : vector<2x32xf32>
    %181 = arith.subf %141, %180 : vector<2x32xf32>
    %182 = arith.mulf %175, %181 : vector<2x32xf32>
    %183 = arith.addf %180, %182 : vector<2x32xf32>
    %184 = vector.extract_strided_slice %163 {offsets = [0, 0], sizes = [2, 64], strides = [1, 1]} : vector<2x96xf32> to vector<2x64xf32>
    %185 = vector.extract_strided_slice %164 {offsets = [0, 0], sizes = [2, 64], strides = [1, 1]} : vector<2x96xf32> to vector<2x64xf32>
    %186 = arith.addf %184, %185 : vector<2x64xf32>
    %187 = arith.negf %186 : vector<2x64xf32>
    %188 = math.exp %187 : vector<2x64xf32>
    %cst_26 = arith.constant 1.000000e+00 : f32
    %189 = vector.broadcast %cst_26 : f32 to vector<2x64xf32>
    %190 = arith.addf %189, %188 : vector<2x64xf32>
    %191 = arith.divf %189, %190 : vector<2x64xf32>
    %192 = vector.extract_strided_slice %191 {offsets = [0, 0], sizes = [2, 32], strides = [1, 1]} : vector<2x64xf32> to vector<2x32xf32>
    %193 = vector.extract_strided_slice %191 {offsets = [0, 32], sizes = [2, 32], strides = [1, 1]} : vector<2x64xf32> to vector<2x32xf32>
    %194 = vector.extract_strided_slice %163 {offsets = [0, 64], sizes = [2, 32], strides = [1, 1]} : vector<2x96xf32> to vector<2x32xf32>
    %195 = vector.extract_strided_slice %164 {offsets = [0, 64], sizes = [2, 32], strides = [1, 1]} : vector<2x96xf32> to vector<2x32xf32>
    %196 = arith.mulf %192, %195 : vector<2x32xf32>
    %197 = arith.addf %194, %196 : vector<2x32xf32>
    %198 = math.tanh %197 : vector<2x32xf32>
    %199 = arith.subf %159, %198 : vector<2x32xf32>
    %200 = arith.mulf %193, %199 : vector<2x32xf32>
    %201 = arith.addf %198, %200 : vector<2x32xf32>
    %202 = tpu.concatenate %183, %201, %7 in 1 : vector<2x32xf32>, vector<2x32xf32>, vector<2x1xf32> -> vector<2x65xf32>
    %cst_27 = arith.constant dense<0.000000e+00> : vector<2x384xf32>
    %203 = tpu.matmul %202, %6, %cst_27 {dimension_numbers = #tpu.dot_dimension_numbers<[1], [0], [0], [1], [0, 0, 1, 1], [], []>} : vector<2x65xf32>, vector<65x384xf32>, vector<2x384xf32> -> vector<2x384xf32>
    %204 = vector.extract_strided_slice %203 {offsets = [0, 0], sizes = [2, 96], strides = [1, 1]} : vector<2x384xf32> to vector<2x96xf32>
    %205 = vector.extract_strided_slice %203 {offsets = [0, 128], sizes = [2, 96], strides = [1, 1]} : vector<2x384xf32> to vector<2x96xf32>
    %206 = vector.extract_strided_slice %203 {offsets = [0, 256], sizes = [2, 96], strides = [1, 1]} : vector<2x384xf32> to vector<2x96xf32>
    %207 = vector.extract_strided_slice %5 {offsets = [10, 0], sizes = [2, 96], strides = [1, 1]} : vector<16x96xf32> to vector<2x96xf32>
    %208 = vector.extract_strided_slice %207 {offsets = [0, 0], sizes = [2, 64], strides = [1, 1]} : vector<2x96xf32> to vector<2x64xf32>
    %209 = vector.extract_strided_slice %204 {offsets = [0, 0], sizes = [2, 64], strides = [1, 1]} : vector<2x96xf32> to vector<2x64xf32>
    %210 = arith.addf %208, %209 : vector<2x64xf32>
    %211 = arith.negf %210 : vector<2x64xf32>
    %212 = math.exp %211 : vector<2x64xf32>
    %cst_28 = arith.constant 1.000000e+00 : f32
    %213 = vector.broadcast %cst_28 : f32 to vector<2x64xf32>
    %214 = arith.addf %213, %212 : vector<2x64xf32>
    %215 = arith.divf %213, %214 : vector<2x64xf32>
    %216 = vector.extract_strided_slice %215 {offsets = [0, 0], sizes = [2, 32], strides = [1, 1]} : vector<2x64xf32> to vector<2x32xf32>
    %217 = vector.extract_strided_slice %215 {offsets = [0, 32], sizes = [2, 32], strides = [1, 1]} : vector<2x64xf32> to vector<2x32xf32>
    %218 = vector.extract_strided_slice %207 {offsets = [0, 64], sizes = [2, 32], strides = [1, 1]} : vector<2x96xf32> to vector<2x32xf32>
    %219 = vector.extract_strided_slice %204 {offsets = [0, 64], sizes = [2, 32], strides = [1, 1]} : vector<2x96xf32> to vector<2x32xf32>
    %220 = arith.mulf %216, %219 : vector<2x32xf32>
    %221 = arith.addf %218, %220 : vector<2x32xf32>
    %222 = math.tanh %221 : vector<2x32xf32>
    %223 = arith.subf %183, %222 : vector<2x32xf32>
    %224 = arith.mulf %217, %223 : vector<2x32xf32>
    %225 = arith.addf %222, %224 : vector<2x32xf32>
    %226 = vector.extract_strided_slice %205 {offsets = [0, 0], sizes = [2, 64], strides = [1, 1]} : vector<2x96xf32> to vector<2x64xf32>
    %227 = vector.extract_strided_slice %206 {offsets = [0, 0], sizes = [2, 64], strides = [1, 1]} : vector<2x96xf32> to vector<2x64xf32>
    %228 = arith.addf %226, %227 : vector<2x64xf32>
    %229 = arith.negf %228 : vector<2x64xf32>
    %230 = math.exp %229 : vector<2x64xf32>
    %cst_29 = arith.constant 1.000000e+00 : f32
    %231 = vector.broadcast %cst_29 : f32 to vector<2x64xf32>
    %232 = arith.addf %231, %230 : vector<2x64xf32>
    %233 = arith.divf %231, %232 : vector<2x64xf32>
    %234 = vector.extract_strided_slice %233 {offsets = [0, 0], sizes = [2, 32], strides = [1, 1]} : vector<2x64xf32> to vector<2x32xf32>
    %235 = vector.extract_strided_slice %233 {offsets = [0, 32], sizes = [2, 32], strides = [1, 1]} : vector<2x64xf32> to vector<2x32xf32>
    %236 = vector.extract_strided_slice %205 {offsets = [0, 64], sizes = [2, 32], strides = [1, 1]} : vector<2x96xf32> to vector<2x32xf32>
    %237 = vector.extract_strided_slice %206 {offsets = [0, 64], sizes = [2, 32], strides = [1, 1]} : vector<2x96xf32> to vector<2x32xf32>
    %238 = arith.mulf %234, %237 : vector<2x32xf32>
    %239 = arith.addf %236, %238 : vector<2x32xf32>
    %240 = math.tanh %239 : vector<2x32xf32>
    %241 = arith.subf %201, %240 : vector<2x32xf32>
    %242 = arith.mulf %235, %241 : vector<2x32xf32>
    %243 = arith.addf %240, %242 : vector<2x32xf32>
    %244 = tpu.concatenate %225, %243, %7 in 1 : vector<2x32xf32>, vector<2x32xf32>, vector<2x1xf32> -> vector<2x65xf32>
    %cst_30 = arith.constant dense<0.000000e+00> : vector<2x384xf32>
    %245 = tpu.matmul %244, %6, %cst_30 {dimension_numbers = #tpu.dot_dimension_numbers<[1], [0], [0], [1], [0, 0, 1, 1], [], []>} : vector<2x65xf32>, vector<65x384xf32>, vector<2x384xf32> -> vector<2x384xf32>
    %246 = vector.extract_strided_slice %245 {offsets = [0, 0], sizes = [2, 96], strides = [1, 1]} : vector<2x384xf32> to vector<2x96xf32>
    %247 = vector.extract_strided_slice %245 {offsets = [0, 128], sizes = [2, 96], strides = [1, 1]} : vector<2x384xf32> to vector<2x96xf32>
    %248 = vector.extract_strided_slice %245 {offsets = [0, 256], sizes = [2, 96], strides = [1, 1]} : vector<2x384xf32> to vector<2x96xf32>
    %249 = vector.extract_strided_slice %5 {offsets = [12, 0], sizes = [2, 96], strides = [1, 1]} : vector<16x96xf32> to vector<2x96xf32>
    %250 = vector.extract_strided_slice %249 {offsets = [0, 0], sizes = [2, 64], strides = [1, 1]} : vector<2x96xf32> to vector<2x64xf32>
    %251 = vector.extract_strided_slice %246 {offsets = [0, 0], sizes = [2, 64], strides = [1, 1]} : vector<2x96xf32> to vector<2x64xf32>
    %252 = arith.addf %250, %251 : vector<2x64xf32>
    %253 = arith.negf %252 : vector<2x64xf32>
    %254 = math.exp %253 : vector<2x64xf32>
    %cst_31 = arith.constant 1.000000e+00 : f32
    %255 = vector.broadcast %cst_31 : f32 to vector<2x64xf32>
    %256 = arith.addf %255, %254 : vector<2x64xf32>
    %257 = arith.divf %255, %256 : vector<2x64xf32>
    %258 = vector.extract_strided_slice %257 {offsets = [0, 0], sizes = [2, 32], strides = [1, 1]} : vector<2x64xf32> to vector<2x32xf32>
    %259 = vector.extract_strided_slice %257 {offsets = [0, 32], sizes = [2, 32], strides = [1, 1]} : vector<2x64xf32> to vector<2x32xf32>
    %260 = vector.extract_strided_slice %249 {offsets = [0, 64], sizes = [2, 32], strides = [1, 1]} : vector<2x96xf32> to vector<2x32xf32>
    %261 = vector.extract_strided_slice %246 {offsets = [0, 64], sizes = [2, 32], strides = [1, 1]} : vector<2x96xf32> to vector<2x32xf32>
    %262 = arith.mulf %258, %261 : vector<2x32xf32>
    %263 = arith.addf %260, %262 : vector<2x32xf32>
    %264 = math.tanh %263 : vector<2x32xf32>
    %265 = arith.subf %225, %264 : vector<2x32xf32>
    %266 = arith.mulf %259, %265 : vector<2x32xf32>
    %267 = arith.addf %264, %266 : vector<2x32xf32>
    %268 = vector.extract_strided_slice %247 {offsets = [0, 0], sizes = [2, 64], strides = [1, 1]} : vector<2x96xf32> to vector<2x64xf32>
    %269 = vector.extract_strided_slice %248 {offsets = [0, 0], sizes = [2, 64], strides = [1, 1]} : vector<2x96xf32> to vector<2x64xf32>
    %270 = arith.addf %268, %269 : vector<2x64xf32>
    %271 = arith.negf %270 : vector<2x64xf32>
    %272 = math.exp %271 : vector<2x64xf32>
    %cst_32 = arith.constant 1.000000e+00 : f32
    %273 = vector.broadcast %cst_32 : f32 to vector<2x64xf32>
    %274 = arith.addf %273, %272 : vector<2x64xf32>
    %275 = arith.divf %273, %274 : vector<2x64xf32>
    %276 = vector.extract_strided_slice %275 {offsets = [0, 0], sizes = [2, 32], strides = [1, 1]} : vector<2x64xf32> to vector<2x32xf32>
    %277 = vector.extract_strided_slice %275 {offsets = [0, 32], sizes = [2, 32], strides = [1, 1]} : vector<2x64xf32> to vector<2x32xf32>
    %278 = vector.extract_strided_slice %247 {offsets = [0, 64], sizes = [2, 32], strides = [1, 1]} : vector<2x96xf32> to vector<2x32xf32>
    %279 = vector.extract_strided_slice %248 {offsets = [0, 64], sizes = [2, 32], strides = [1, 1]} : vector<2x96xf32> to vector<2x32xf32>
    %280 = arith.mulf %276, %279 : vector<2x32xf32>
    %281 = arith.addf %278, %280 : vector<2x32xf32>
    %282 = math.tanh %281 : vector<2x32xf32>
    %283 = arith.subf %243, %282 : vector<2x32xf32>
    %284 = arith.mulf %277, %283 : vector<2x32xf32>
    %285 = arith.addf %282, %284 : vector<2x32xf32>
    %286 = tpu.concatenate %267, %285, %7 in 1 : vector<2x32xf32>, vector<2x32xf32>, vector<2x1xf32> -> vector<2x65xf32>
    %cst_33 = arith.constant dense<0.000000e+00> : vector<2x384xf32>
    %287 = tpu.matmul %286, %6, %cst_33 {dimension_numbers = #tpu.dot_dimension_numbers<[1], [0], [0], [1], [0, 0, 1, 1], [], []>} : vector<2x65xf32>, vector<65x384xf32>, vector<2x384xf32> -> vector<2x384xf32>
    %288 = vector.extract_strided_slice %287 {offsets = [0, 0], sizes = [2, 96], strides = [1, 1]} : vector<2x384xf32> to vector<2x96xf32>
    %289 = vector.extract_strided_slice %287 {offsets = [0, 128], sizes = [2, 96], strides = [1, 1]} : vector<2x384xf32> to vector<2x96xf32>
    %290 = vector.extract_strided_slice %287 {offsets = [0, 256], sizes = [2, 96], strides = [1, 1]} : vector<2x384xf32> to vector<2x96xf32>
    %291 = vector.extract_strided_slice %5 {offsets = [14, 0], sizes = [2, 96], strides = [1, 1]} : vector<16x96xf32> to vector<2x96xf32>
    %292 = vector.extract_strided_slice %291 {offsets = [0, 0], sizes = [2, 64], strides = [1, 1]} : vector<2x96xf32> to vector<2x64xf32>
    %293 = vector.extract_strided_slice %288 {offsets = [0, 0], sizes = [2, 64], strides = [1, 1]} : vector<2x96xf32> to vector<2x64xf32>
    %294 = arith.addf %292, %293 : vector<2x64xf32>
    %295 = arith.negf %294 : vector<2x64xf32>
    %296 = math.exp %295 : vector<2x64xf32>
    %cst_34 = arith.constant 1.000000e+00 : f32
    %297 = vector.broadcast %cst_34 : f32 to vector<2x64xf32>
    %298 = arith.addf %297, %296 : vector<2x64xf32>
    %299 = arith.divf %297, %298 : vector<2x64xf32>
    %300 = vector.extract_strided_slice %299 {offsets = [0, 0], sizes = [2, 32], strides = [1, 1]} : vector<2x64xf32> to vector<2x32xf32>
    %301 = vector.extract_strided_slice %299 {offsets = [0, 32], sizes = [2, 32], strides = [1, 1]} : vector<2x64xf32> to vector<2x32xf32>
    %302 = vector.extract_strided_slice %291 {offsets = [0, 64], sizes = [2, 32], strides = [1, 1]} : vector<2x96xf32> to vector<2x32xf32>
    %303 = vector.extract_strided_slice %288 {offsets = [0, 64], sizes = [2, 32], strides = [1, 1]} : vector<2x96xf32> to vector<2x32xf32>
    %304 = arith.mulf %300, %303 : vector<2x32xf32>
    %305 = arith.addf %302, %304 : vector<2x32xf32>
    %306 = math.tanh %305 : vector<2x32xf32>
    %307 = arith.subf %267, %306 : vector<2x32xf32>
    %308 = arith.mulf %301, %307 : vector<2x32xf32>
    %309 = arith.addf %306, %308 : vector<2x32xf32>
    %310 = vector.extract_strided_slice %289 {offsets = [0, 0], sizes = [2, 64], strides = [1, 1]} : vector<2x96xf32> to vector<2x64xf32>
    %311 = vector.extract_strided_slice %290 {offsets = [0, 0], sizes = [2, 64], strides = [1, 1]} : vector<2x96xf32> to vector<2x64xf32>
    %312 = arith.addf %310, %311 : vector<2x64xf32>
    %313 = arith.negf %312 : vector<2x64xf32>
    %314 = math.exp %313 : vector<2x64xf32>
    %cst_35 = arith.constant 1.000000e+00 : f32
    %315 = vector.broadcast %cst_35 : f32 to vector<2x64xf32>
    %316 = arith.addf %315, %314 : vector<2x64xf32>
    %317 = arith.divf %315, %316 : vector<2x64xf32>
    %318 = vector.extract_strided_slice %317 {offsets = [0, 0], sizes = [2, 32], strides = [1, 1]} : vector<2x64xf32> to vector<2x32xf32>
    %319 = vector.extract_strided_slice %317 {offsets = [0, 32], sizes = [2, 32], strides = [1, 1]} : vector<2x64xf32> to vector<2x32xf32>
    %320 = vector.extract_strided_slice %289 {offsets = [0, 64], sizes = [2, 32], strides = [1, 1]} : vector<2x96xf32> to vector<2x32xf32>
    %321 = vector.extract_strided_slice %290 {offsets = [0, 64], sizes = [2, 32], strides = [1, 1]} : vector<2x96xf32> to vector<2x32xf32>
    %322 = arith.mulf %318, %321 : vector<2x32xf32>
    %323 = arith.addf %320, %322 : vector<2x32xf32>
    %324 = math.tanh %323 : vector<2x32xf32>
    %325 = arith.subf %285, %324 : vector<2x32xf32>
    %326 = arith.mulf %319, %325 : vector<2x32xf32>
    %327 = arith.addf %324, %326 : vector<2x32xf32>
    %328 = tpu.concatenate %309, %327, %7 in 1 : vector<2x32xf32>, vector<2x32xf32>, vector<2x1xf32> -> vector<2x65xf32>
    %cst_36 = arith.constant dense<0.000000e+00> : vector<2x384xf32>
    %329 = tpu.matmul %328, %6, %cst_36 {dimension_numbers = #tpu.dot_dimension_numbers<[1], [0], [0], [1], [0, 0, 1, 1], [], []>} : vector<2x65xf32>, vector<65x384xf32>, vector<2x384xf32> -> vector<2x384xf32>
    %330 = vector.extract_strided_slice %329 {offsets = [0, 128], sizes = [2, 96], strides = [1, 1]} : vector<2x384xf32> to vector<2x96xf32>
    %331 = vector.extract_strided_slice %329 {offsets = [0, 256], sizes = [2, 96], strides = [1, 1]} : vector<2x384xf32> to vector<2x96xf32>
    %332 = vector.extract_strided_slice %330 {offsets = [0, 0], sizes = [2, 64], strides = [1, 1]} : vector<2x96xf32> to vector<2x64xf32>
    %333 = vector.extract_strided_slice %331 {offsets = [0, 0], sizes = [2, 64], strides = [1, 1]} : vector<2x96xf32> to vector<2x64xf32>
    %334 = arith.addf %332, %333 : vector<2x64xf32>
    %335 = arith.negf %334 : vector<2x64xf32>
    %336 = math.exp %335 : vector<2x64xf32>
    %cst_37 = arith.constant 1.000000e+00 : f32
    %337 = vector.broadcast %cst_37 : f32 to vector<2x64xf32>
    %338 = arith.addf %337, %336 : vector<2x64xf32>
    %339 = arith.divf %337, %338 : vector<2x64xf32>
    %340 = vector.extract_strided_slice %339 {offsets = [0, 0], sizes = [2, 32], strides = [1, 1]} : vector<2x64xf32> to vector<2x32xf32>
    %341 = vector.extract_strided_slice %339 {offsets = [0, 32], sizes = [2, 32], strides = [1, 1]} : vector<2x64xf32> to vector<2x32xf32>
    %342 = vector.extract_strided_slice %330 {offsets = [0, 64], sizes = [2, 32], strides = [1, 1]} : vector<2x96xf32> to vector<2x32xf32>
    %343 = vector.extract_strided_slice %331 {offsets = [0, 64], sizes = [2, 32], strides = [1, 1]} : vector<2x96xf32> to vector<2x32xf32>
    %344 = arith.mulf %340, %343 : vector<2x32xf32>
    %345 = arith.addf %342, %344 : vector<2x32xf32>
    %346 = math.tanh %345 : vector<2x32xf32>
    %347 = arith.subf %327, %346 : vector<2x32xf32>
    %348 = arith.mulf %341, %347 : vector<2x32xf32>
    %349 = arith.addf %346, %348 : vector<2x32xf32>
    %c0_38 = arith.constant 0 : index
    %c0_39 = arith.constant 0 : index
    %350 = vector.load %arg6[%c0_38, %c0_39] : memref<32x4xf32, #tpu.memory_space<vmem>>, vector<32x4xf32>
    %cst_40 = arith.constant dense<0.000000e+00> : vector<2x4xf32>
    %351 = tpu.matmul %349, %350, %cst_40 {dimension_numbers = #tpu.dot_dimension_numbers<[1], [0], [0], [1], [0, 0, 1, 1], [], []>} : vector<2x32xf32>, vector<32x4xf32>, vector<2x4xf32> -> vector<2x4xf32>
    %c0_41 = arith.constant 0 : index
    %c0_42 = arith.constant 0 : index
    %352 = vector.load %arg7[%c0_41, %c0_42] : memref<1x4xf32, #tpu.memory_space<vmem>>, vector<1x4xf32>
    %353 = vector.broadcast %352 : vector<1x4xf32> to vector<2x4xf32>
    %354 = arith.addf %351, %353 : vector<2x4xf32>
    %c0_43 = arith.constant 0 : index
    %c0_44 = arith.constant 0 : index
    %355 = vector.load %arg8[%c0_43, %c0_44] : memref<2x4xf32, #tpu.memory_space<vmem>>, vector<2x4xf32>
    tpu.vector_store %arg8[%c0_43, %c0_44], %354 {strides = array<i32>} : memref<2x4xf32, #tpu.memory_space<vmem>>, vector<2x4xf32>,
    %c0_45 = arith.constant 0 : index
    %c0_46 = arith.constant 0 : index
    %c0_47 = arith.constant 0 : index
    %356 = vector.load %arg9[%c0_45, %c0_46, %c0_47] : memref<2x2x32xf32, #tpu.memory_space<vmem>>, vector<1x2x32xf32>
    %357 = vector.shape_cast %356 : vector<1x2x32xf32> to vector<2x32xf32>
    %358 = vector.shape_cast %309 : vector<2x32xf32> to vector<1x2x32xf32>
    tpu.vector_store %arg9[%c0_45, %c0_46, %c0_47], %358 {strides = array<i32>} : memref<2x2x32xf32, #tpu.memory_space<vmem>>, vector<1x2x32xf32>,
    %c1_48 = arith.constant 1 : index
    %c0_49 = arith.constant 0 : index
    %c0_50 = arith.constant 0 : index
    %359 = vector.load %arg9[%c1_48, %c0_49, %c0_50] : memref<2x2x32xf32, #tpu.memory_space<vmem>>, vector<1x2x32xf32>
    %360 = vector.shape_cast %359 : vector<1x2x32xf32> to vector<2x32xf32>
    %361 = vector.shape_cast %349 : vector<2x32xf32> to vector<1x2x32xf32>
    tpu.vector_store %arg9[%c1_48, %c0_49, %c0_50], %361 {strides = array<i32>} : memref<2x2x32xf32, #tpu.memory_space<vmem>>, vector<1x2x32xf32>,
    return
  }
  func.func @transform_0(%arg0: i32) -> (i32, i32) {
    %c0_i32 = arith.constant 0 : i32
    %c0_i32_0 = arith.constant 0 : i32
    %c0_i32_1 = arith.constant 0 : i32
    return %c0_i32, %c0_i32_0 : i32, i32
  }
  func.func @transform_1(%arg0: i32) -> (i32, i32, i32) {
    %c0_i32 = arith.constant 0 : i32
    %c0_i32_0 = arith.constant 0 : i32
    %c0_i32_1 = arith.constant 0 : i32
    %c0_i32_2 = arith.constant 0 : i32
    return %c0_i32, %c0_i32_0, %c0_i32_1 : i32, i32, i32
  }
  func.func @transform_2(%arg0: i32) -> (i32, i32) {
    %c0_i32 = arith.constant 0 : i32
    %c0_i32_0 = arith.constant 0 : i32
    %c0_i32_1 = arith.constant 0 : i32
    return %c0_i32, %c0_i32_0 : i32, i32
  }
  func.func @transform_3(%arg0: i32) -> (i32, i32) {
    %c0_i32 = arith.constant 0 : i32
    %c0_i32_0 = arith.constant 0 : i32
    %c0_i32_1 = arith.constant 0 : i32
    return %c0_i32, %c0_i32_0 : i32, i32
  }
  func.func @transform_4(%arg0: i32) -> (i32, i32) {
    %c0_i32 = arith.constant 0 : i32
    %c0_i32_0 = arith.constant 0 : i32
    %c0_i32_1 = arith.constant 0 : i32
    return %c0_i32, %c0_i32_0 : i32, i32
  }
  func.func @transform_5(%arg0: i32) -> (i32, i32) {
    %c0_i32 = arith.constant 0 : i32
    %c0_i32_0 = arith.constant 0 : i32
    %c0_i32_1 = arith.constant 0 : i32
    return %c0_i32, %c0_i32_0 : i32, i32
  }
  func.func @transform_6(%arg0: i32) -> (i32, i32) {
    %c0_i32 = arith.constant 0 : i32
    %c0_i32_0 = arith.constant 0 : i32
    %c0_i32_1 = arith.constant 0 : i32
    return %c0_i32, %c0_i32_0 : i32, i32
  }
  func.func @transform_7(%arg0: i32) -> (i32, i32) {
    %c0_i32 = arith.constant 0 : i32
    %c0_i32_0 = arith.constant 0 : i32
    %c0_i32_1 = arith.constant 0 : i32
    return %c0_i32, %c0_i32_0 : i32, i32
  }
  func.func @transform_8(%arg0: i32) -> (i32, i32, i32) {
    %c0_i32 = arith.constant 0 : i32
    %c0_i32_0 = arith.constant 0 : i32
    %c0_i32_1 = arith.constant 0 : i32
    %c0_i32_2 = arith.constant 0 : i32
    return %c0_i32, %c0_i32_0, %c0_i32_1 : i32, i32, i32
  }
}

</mosaic_0001>

<bundles_post_ra>
// kernel: tpu_custom_call.1
= control target key start
LH: loop header
LB: loop body
LE: loop exit
PB: predicated region body
PF: predicated region fallthrough
CT: control target
= control target key end

     0   :  { %14 = vsyncpa [#allocation3], 0  ;;  %s3498_s0 = inlined_call_operand.vmem [shape: f32[16,16], index: 0, kind: input, shape index: {}]   ;;  %s3499_s1 = inlined_call_operand.vmem [shape: f32[2,2,32], index: 1, kind: input, shape index: {}]   ;;  %s3500_s2 = inlined_call_operand.vmem [shape: f32[16,96], index: 2, kind: input, shape index: {}]   ;;  %s3501_s3 = inlined_call_operand.vmem [shape: f32[1,96], index: 3, kind: input, shape index: {}]   ;;  %s3502_s4 = inlined_call_operand.hbm [shape: f32[65,384], index: 4, kind: input, shape index: {}]   ;;  %s3503_s5 = inlined_call_operand.vmem [shape: f32[32,4], index: 5, kind: input, shape index: {}]   ;;  %s3504_s6 = inlined_call_operand.vmem [shape: f32[1,4], index: 6, kind: input, shape index: {}]   ;;  %s3505_s7 = inlined_call_operand.hbm [shape: f32[2,4], index: 7, kind: output, shape index: {0}]   ;;  %s3506_s8 = inlined_call_operand.hbm [shape: f32[2,2,32], index: 8, kind: output, shape index: {1}]  }
   0x1   :  { %15 = vsyncpa [#allocation4], 0 }
   0x2   :  { %16 = vsyncpa [#allocation7], 0  ;;  %s2908_s27 = smov [#allocation2]   ;;  %s2836_s9 = scalar_lea.hbm %s3502_s4, 3456 }
   0x3   :  { %s30_s28 = sshll.u32 %s2908_s27, 4  ;;  %p2837_p0 = scmp.ne.s32.totalorder %s3502_s4, %s2836_s9  ;;  %s31_s28 = int_to_ptr.vmem [resolvable:$true] %s30_s28 }
   0x4   :  { %p2840_p1 = scmp.lt.u32.totalorder %s2836_s9, %s3502_s4 }
   0x6   :  { %p2842_p2 = pnand %p2840_p1, %p2837_p0 }
   0x8   :  { %2845 = shalt.err (!%p2842_p2)
}
   0x9   :  { %s2846_s14 = scalar_lea.vmem %s31_s28, 3456  ;;  %p2851_p4 = scmp.lt.s32.totalorder %s31_s28, %s31_s28 }
   0xa   :  { %p2847_p3 = scmp.ne.s32.totalorder %s31_s28, %s2846_s14  ;;  %p2852_p5 = scmp.lt.s32.totalorder %s2846_s14, %s2846_s14 }
   0xc   :  { %p2853_p6 = por %p2852_p5, %p2851_p4 }
   0xe   :  { %p2854_p7 = pnand %p2853_p6, %p2847_p3 }
  0x10   :  { %2857 = shalt.err (!%p2854_p7)
}
  0x11   :  { %s2909_s15 = smov 384   ;;  %s2910_s16 = smov 24  }
  0x12   :  { %36 = dma.hbm_to_vmem [thread:$0]  %s3502_s4, 3456, %s31_s28, [#allocation3], %s2909_s15, %s2909_s15, %s2910_s16  }
  0x13   :  { %2902 = dma.done.wait [#allocation3], 3456  }
  0x14   :  { %2903 = vsyncadd [#allocation3], 4294963840  ;;  %v2911_v0 = vmov 0.0   ;;  %v2981_v1 = vld [vmem:[%s3499_s1 + $0x2] sm:$0x3]  ;;  %v138_v2 = vld [vmem:[#allocation2 + $0x8] sm:$0xff] }
  0x15   :  { %250 = vmatprep.mubr.f32.mxu1 %v2911_v0  ;;  %v141_v3 = vld [vmem:[#allocation2 + $0x20] sm:$0xff]  ;;  %s2912_s21 = smov 32   ;;  %v140_v6 = vld [vmem:[#allocation2 + $0x18] sm:$0xff]  ;;  %v147_v9 = vld [vmem:[#allocation2 + $0x50] sm:$0xff]  ;;  %vm55_vm0 = vcmask 130048   ;;  %vm179_vm1 = vcmask 1040384  }
  0x16   :  { %168 = vrot.lane.b32.xlu0 %v2981_v1, %s2912_s21  ;;  %v2985_v4 = vpack.c.bf16 %v141_v3, %v138_v2  ;;  %v137_v5 = vld [vmem:[#allocation2] sm:$0xff]  ;;  %v144_v7 = vld [vmem:[#allocation2 + $0x38] sm:$0xff]  ;;  %v143_v10 = vld [vmem:[#allocation2 + $0x30] sm:$0xff]  ;;  %vm171_vm2 = vcmask 261120   ;;  %vm173_vm3 = vcmask 523264   ;;  %vm175_vm4 = vcmask 531456  }
  0x17   :  { %v2987_v8 = vpack.c.bf16 %v140_v6, %v137_v5  ;;  %v146_v11 = vld [vmem:[#allocation2 + $0x48] sm:$0xff]  ;;  %v2990_v12 = vpack.c.bf16 %v147_v9, %v144_v7  ;;  %v153_v14 = vld [vmem:[#allocation2 + $0x80] sm:$0xff]  ;;  %v152_v20 = vld [vmem:[#allocation2 + $0x78] sm:$0xff]  ;;  %v2914_v59 = vmov 0.0|0.0   ;;  %vm2915_vm5 = vmmov 0   ;;  %s2917_s17 = smov [#allocation6]  }
  0x18   :  { %2480 = vmatprep.subr.bf16.mxu1 %v2985_v4  ;;  %v150_v13 = vld [vmem:[#allocation2 + $0x68] sm:$0xff]  ;;  %v2993_v15 = vpack.c.bf16 %v146_v11, %v143_v10  ;;  %v46_v16 = vld [vmem:[%s3500_s2] sm:$0xff]  ;;  %v156_v22 = vld [vmem:[#allocation2 + $0x98] sm:$0xff]  ;;  %vm2098_vm6 = vcmask 261126   ;;  %vm2102_vm7 = vcmask 254976  }
  0x19   :  { %2482 = vmatpush1.bf16.msra.mxu1 %v2987_v8  ;;  %v47_v17 = vld [vmem:[%s3500_s2 + $0x8] sm:$0xff]  ;;  %v3002_v18 = vpack.c.bf16 %v153_v14, %v150_v13  ;;  %v149_v19 = vld [vmem:[#allocation2 + $0x60] sm:$0xff]  ;;  %v159_v23 = vld [vmem:[#allocation2 + $0xb0] sm:$0xff] }
  0x1a   :  { %2484 = vmatprep.subr.bf16.mxu1 %v2990_v12  ;;  %v2475_v21 = vpack.c.bf16 %v47_v17, %v46_v16  ;;  %v44_v24 = vld [vmem:[%s3498_s0] sm:$0xff]  ;;  %v3009_v25 = vpack.c.bf16 %v152_v20, %v149_v19  ;;  %v45_v26 = vld [vmem:[%s3498_s0 + $0x8] sm:$0xff]  ;;  %v3015_v27 = vpack.c.bf16 %v159_v23, %v156_v22  ;;  %v155_v28 = vld [vmem:[#allocation2 + $0x90] sm:$0xff] }
  0x1b   :  { %2293 = vmatprep.mubr.msk.f32.mxu0 %vm55_vm0, %v44_v24  ;;  %v158_v29 = vld [vmem:[#allocation2 + $0xa8] sm:$0xff]  ;;  %v3032_v32 = vld [vmem:[#allocation2 + $0xc0] sm:$0x1]  ;;  %v139_v56 = vld [vmem:[#allocation2 + $0x10] sm:$0xff] }
  0x1c   :  { %2476 = vmatprep.subr.bf16.mxu0 %v2475_v21  ;;  %v3020_v30 = vpack.c.bf16 %v158_v29, %v155_v28  ;;  %v3025_v31 = vld [vmem:[#allocation2 + $0xc8] sm:$0x1]  ;;  %v164_v33 = vld [vmem:[%s3499_s1] sm:$0x3]  ;;  %s2913_s1 = smov 64   ;;  %v148_v61 = vld [vmem:[#allocation2 + $0x58] sm:$0xff] }
  0x1d   :  { %2486 = vmatpush1.bf16.msra.mxu1 %v2993_v15  ;;  %2478 = vmatpush3.bf16.msra.mxu0 %v2475_v21  ;;  %v2135_v38 = vld [vmem:[%s3501_s3] ss:$0 sm:$0xff]  ;;  %v142_v57 = vld [vmem:[#allocation2 + $0x28] sm:$0xff]  ;;  %v151_v63 = vld [vmem:[#allocation2 + $0x70] sm:$0xff]  ;;  %s2916_s3 = smov 96  }
  0x1e   :  { %2488 = vmatprep.subr.bf16.mxu1 %v3002_v18  ;;  %2496 = vmatprep.subr.bf16.mxu0 %v2985_v4  ;;  %v145_v58 = vld [vmem:[#allocation2 + $0x40] sm:$0xff]  ;;  %v3068_v60 = vpack.c.bf16 %v142_v57, %v139_v56  ;;  %v154_v2 = vld [vmem:[#allocation2 + $0x88] sm:$0xff]  ;;  %v160_v7 = vld [vmem:[#allocation2 + $0xb8] sm:$0xff] }
  0x1f   :  { %v3071_v62 = vpack.c.bf16 %v148_v61, %v145_v58  ;;  %v3075_v3 = vpack.c.bf16 %v154_v2, %v151_v63  ;;  %v157_v6 = vld [vmem:[#allocation2 + $0xa0] sm:$0xff]  ;;  %v3085_v11 = vld [vmem:[#allocation2 + $0xd0] sm:$0x1] }
  0x20   :  { %2294 = vmatmul.mubr.msk.f32.vlgmr.msra.gmra.mrb[0].mxu0 %vm55_vm0, %v45_v26  ;;  %v3080_v10 = vpack.c.bf16 %v160_v7, %v157_v6 }
  0x21   :  { %2490 = vmatpush1.bf16.msra.mxu1 %v3009_v25  ;;  %2498 = vmatpush1.bf16.msra.mxu0 %v2987_v8 }
  0x22   :  { %2492 = vmatprep.subr.bf16.mxu1 %v3015_v27  ;;  %2500 = vmatprep.subr.bf16.mxu0 %v2990_v12 }
  0x23   :  { %365 = vmatprep.mubr.f32.mxu0 %v2911_v0 }
  0x25   :  { %2494 = vmatpush1.bf16.msra.mxu1 %v3020_v30  ;;  %2502 = vmatpush1.bf16.msra.mxu0 %v2993_v15 }
  0x26   :  { %2139 = vmatprep.subr.msk.mxu1 %vm179_vm1, %v3025_v31  ;;  %2504 = vmatprep.subr.bf16.mxu0 %v3002_v18 }
  0x29   :  { %2140 = vmatpush1.msk.msra.mxu1 %vm179_vm1, %v3032_v32  ;;  %2506 = vmatpush1.bf16.msra.mxu0 %v3009_v25 }
  0x2a   :  { %2508 = vmatprep.subr.bf16.mxu0 %v3015_v27  ;;  %2511 = vmatprep.subr.bf16.mxu1 %v2914_v59 }
  0x2d   :  { %2510 = vmatpush1.bf16.msra.mxu0 %v3020_v30 }
  0x2e   :  { %2143 = vmatprep.subr.msk.mxu0 %vm179_vm1, %v3025_v31 }
  0x31   :  { %2144 = vmatpush1.msk.msra.mxu0 %vm179_vm1, %v3032_v32 }
  0x32   :  { %2524 = vmatprep.subr.bf16.mxu0 %v2985_v4 }
  0x88   :  { %v3048_v34 = vpop.permute.xlu0 %168 }
  0x89   :  { %v172_v35 = vsel %vm171_vm2, %v164_v33, %v3048_v34 }
  0x8a   :  { %v174_v36 = vsel %vm173_vm3, %v172_v35, 1.0 }
  0x8b   :  { %2141 = vmatmul.mubr.msk.f32.vlgmr.msra.gmra.mrb[0].mxu1 %vm175_vm4, %v174_v36 }
  0x8c   :  { %2513 = vmatpush3.bf16.msra.mxu1 %v3068_v60  ;;  %2314 = vmatprep.mubr.msk.f32.mxu1 %vm2915_vm5, %v2911_v0 }
  0x8d   :  { %2514 = vmatprep.subr.bf16.mxu1 %v2914_v59 }
  0x90   :  { %2516 = vmatpush3.bf16.msra.mxu1 %v3071_v62 }
  0x91   :  { %2517 = vmatprep.subr.bf16.mxu1 %v2914_v59 }
  0x94   :  { %2519 = vmatpush3.bf16.msra.mxu1 %v3075_v3 }
  0x95   :  { %2520 = vmatprep.subr.bf16.mxu1 %v2914_v59 }
  0x98   :  { %2522 = vmatpush3.bf16.msra.mxu1 %v3080_v10 }
  0x99   :  { %2312 = vmatprep.subr.mxu1 %v2911_v0 }
  0x9c   :  { %2313 = vmatpush3.msk.msra.mxu1 %vm179_vm1, %v3085_v11 }
  0x9d   :  { %2539 = vmatprep.subr.bf16.mxu1 %v2914_v59 }
  0xf3   :  { %v2295_v37 = vpop.f32.mrb[0].mxu0 }
  0xf4   :  { %v3057_v39 = vadd.f32 %v2295_v37, %v2135_v38  ;;  %v128_v40 = vpop.f32.mrb[1].mxu0 }
  0xf5   :  { %v3060_v43 = vadd.f32 %v2135_v38, %v128_v40 }
 0x15e   :  { %v252_v41 = vpop.f32.mrb[0].mxu1 }
 0x15f   :  { %264 = vrot.lane.b32.xlu0 %v252_v41, %s2913_s1  ;;  %v254_v42 = vpop.f32.mrb[1].mxu1  ;;  %v256_v44 = vadd.f32 %v252_v41, %v3060_v43 }
 0x161   :  { %v2142_v45 = vmul.f32 -1.442695, %v256_v44 }
 0x163   :  { %2737 = vpow2.f32 %v2142_v45 }
 0x16d   :  { %v2738_v46 = vpop.eup %2737 }
 0x16e   :  { %v260_v47 = vadd.f32 1.0, %v2738_v46 }
 0x170   :  { %2739 = vrcp.f32 %v260_v47 }
 0x17a   :  { %v2740_v48 = vpop.eup %2739 }
 0x1d1   :  { %v265_v49 = vpop.permute.xlu0 %264 }
 0x1d2   :  { %v267_v50 = vmul.f32 %v2740_v48, %v265_v49 }
 0x1d4   :  { %269 = vrot.lane.b32.xlu1 %v267_v50, %s2913_s1 }
 0x246   :  { %v270_v51 = vpop.permute.xlu1 %269 }
 0x247   :  { %v272_v52 = vadd.f32 %v270_v51, %v3060_v43 }
 0x249   :  { %2741 = vtanh.f32 %v272_v52 }
 0x253   :  { %v2742_v53 = vpop.eup %2741 }
 0x254   :  { %275 = vrot.lane.b32.xlu1 %v2742_v53, %s2913_s1 }
 0x2c6   :  { %v276_v54 = vpop.permute.xlu1 %275 }
 0x2c7   :  { %v278_v55 = vsub.f32 %v164_v33, %v276_v54 }
 0x2c9   :  { %280 = vrot.lane.b32.xlu0 %v278_v55, %s2912_s21 }
 0x33b   :  { %v281_v5 = vpop.permute.xlu0 %280 }
 0x33c   :  { %v283_v9 = vmul.f32 %v2740_v48, %v281_v5 }
 0x33e   :  { %285 = vrot.lane.b32.xlu1 %v283_v9, %s2912_s21 }
 0x3b0   :  { %v286_v13 = vpop.permute.xlu1 %285 }
 0x3b1   :  { %v3092_v14 = vadd.f32 %v2742_v53, %v286_v13 }
 0x3b3   :  { %290 = vrot.lane.b32.xlu0 %v3092_v14, %s2913_s1 }
 0x425   :  { %v291_v16 = vpop.permute.xlu0 %290 }
 0x426   :  { %v293_v17 = vsel %vm171_vm2, %v291_v16, %v3048_v34 }
 0x427   :  { %v294_v19 = vsel %vm173_vm3, %v293_v17, 1.0 }
 0x428   :  { %2145 = vmatmul.mubr.msk.f32.vlgmr.msra.gmra.mrb[2].mxu0 %vm175_vm4, %v294_v19  ;;  %2315 = vmatmul.mubr.msk.f32.vlgmr.msra.gmra.mrb[2].mxu1 %vm175_vm4, %v294_v19 }
 0x429   :  { %2526 = vmatpush1.bf16.msra.mxu0 %v2987_v8  ;;  %2541 = vmatpush3.bf16.msra.mxu1 %v3068_v60 }
 0x42a   :  { %2528 = vmatprep.subr.bf16.mxu0 %v2990_v12  ;;  %2542 = vmatprep.subr.bf16.mxu1 %v2914_v59 }
 0x42b   :  { %589 = vmatprep.mubr.f32.mxu0 %v2911_v0  ;;  %2335 = vmatprep.mubr.msk.f32.mxu1 %vm2915_vm5, %v2911_v0 }
 0x42d   :  { %2530 = vmatpush1.bf16.msra.mxu0 %v2993_v15  ;;  %2544 = vmatpush3.bf16.msra.mxu1 %v3071_v62 }
 0x42e   :  { %2532 = vmatprep.subr.bf16.mxu0 %v3002_v18  ;;  %2545 = vmatprep.subr.bf16.mxu1 %v2914_v59 }
 0x431   :  { %2534 = vmatpush1.bf16.msra.mxu0 %v3009_v25  ;;  %2547 = vmatpush3.bf16.msra.mxu1 %v3075_v3 }
 0x432   :  { %2536 = vmatprep.subr.bf16.mxu0 %v3015_v27  ;;  %2548 = vmatprep.subr.bf16.mxu1 %v2914_v59 }
 0x435   :  { %2538 = vmatpush1.bf16.msra.mxu0 %v3020_v30  ;;  %2550 = vmatpush3.bf16.msra.mxu1 %v3080_v10 }
 0x436   :  { %2150 = vmatprep.subr.msk.mxu0 %vm179_vm1, %v3025_v31  ;;  %2333 = vmatprep.subr.mxu1 %v2911_v0 }
 0x439   :  { %2151 = vmatpush1.msk.msra.mxu0 %vm179_vm1, %v3032_v32  ;;  %2334 = vmatpush3.msk.msra.mxu1 %vm179_vm1, %v3085_v11 }
 0x43a   :  { %2552 = vmatprep.subr.bf16.mxu0 %v2985_v4  ;;  %2567 = vmatprep.subr.bf16.mxu1 %v2914_v59 }
 0x4fb   :  { %v367_v20 = vpop.f32.mrb[2].mxu0  ;;  %v438_v21 = vpop.f32.mrb[2].mxu1 }
 0x4fc   :  { %v443_v22 = vrot.slane %v367_v20, 6  ;;  %485 = vrot.lane.b32.xlu1 %v438_v21, %s2913_s1  ;;  %v369_v23 = vpop.f32.mrb[3].mxu0  ;;  %v2316_v24 = vpop.f32.mrb[3].mxu1 }
 0x4fd   :  { %v477_v26 = vadd.f32 %v438_v21, %v369_v23 }
 0x4fe   :  { %452 = vrot.lane.b32.xlu0 %v443_v22, %s2913_s1  ;;  %v445_v28 = vadd.f32 %v443_v22, %v3060_v43 }
 0x4ff   :  { %v2149_v29 = vmul.f32 -1.442695, %v477_v26 }
 0x500   :  { %v2148_v33 = vmul.f32 -1.442695, %v445_v28 }
 0x501   :  { %2743 = vpow2.f32 %v2149_v29 }
 0x502   :  { %2745 = vpow2.f32 %v2148_v33 }
 0x50b   :  { %v2744_v34 = vpop.eup %2743 }
 0x50c   :  { %v2746_v35 = vpop.eup %2745  ;;  %v481_v36 = vadd.f32 1.0, %v2744_v34 }
 0x50d   :  { %v449_v37 = vadd.f32 1.0, %v2746_v35 }
 0x50e   :  { %2747 = vrcp.f32 %v481_v36 }
 0x50f   :  { %2749 = vrcp.f32 %v449_v37 }
 0x518   :  { %v2748_v38 = vpop.eup %2747 }
 0x519   :  { %v2750_v42 = vpop.eup %2749 }
 0x56e   :  { %v486_v40 = vpop.permute.xlu1 %485 }
 0x56f   :  { %v488_v41 = vmul.f32 %v2748_v38, %v486_v40 }
 0x570   :  { %v453_v44 = vpop.permute.xlu0 %452 }
 0x571   :  { %v455_v45 = vmul.f32 %v2750_v42, %v453_v44  ;;  %490 = vrot.lane.b32.xlu1 %v488_v41, %s2913_s1 }
 0x573   :  { %457 = vrot.lane.b32.xlu0 %v455_v45, %s2913_s1 }
 0x5e3   :  { %v491_v46 = vpop.permute.xlu1 %490 }
 0x5e4   :  { %v493_v47 = vadd.f32 %v491_v46, %v369_v23 }
 0x5e5   :  { %v458_v48 = vpop.permute.xlu0 %457 }
 0x5e6   :  { %2751 = vtanh.f32 %v493_v47  ;;  %v460_v49 = vadd.f32 %v458_v48, %v3060_v43 }
 0x5e8   :  { %2753 = vtanh.f32 %v460_v49 }
 0x5f0   :  { %v2752_v50 = vpop.eup %2751 }
 0x5f1   :  { %496 = vrot.lane.b32.xlu1 %v2752_v50, %s2913_s1 }
 0x5f2   :  { %v2754_v51 = vpop.eup %2753 }
 0x5f3   :  { %v463_v52 = vrot.slane %v2754_v51, 2 }
 0x5f5   :  { %v465_v53 = vsub.f32 %v3092_v14, %v463_v52 }
 0x5f7   :  { %v467_v54 = vrot.slane %v465_v53, 6 }
 0x5f9   :  { %468 = vrot.lane.b32.xlu1 %v467_v54, %s2916_s3 }
 0x663   :  { %v497_v55 = vpop.permute.xlu1 %496 }
 0x664   :  { %v499_v56 = vsub.f32 %v2981_v1, %v497_v55 }
 0x666   :  { %501 = vrot.lane.b32.xlu0 %v499_v56, %s2912_s21 }
 0x66b   :  { %v469_v57 = vpop.permute.xlu1 %468 }
 0x66c   :  { %v471_v58 = vmul.f32 %v2750_v42, %v469_v57 }
 0x66e   :  { %473 = vrot.lane.b32.xlu1 %v471_v58, %s2912_s21 }
 0x6d8   :  { %v502_v61 = vpop.permute.xlu0 %501 }
 0x6d9   :  { %v504_v63 = vmul.f32 %v2748_v38, %v502_v61 }
 0x6db   :  { %506 = vrot.lane.b32.xlu0 %v504_v63, %s2912_s21 }
 0x6e0   :  { %v474_v2 = vpop.permute.xlu1 %473 }
 0x6e1   :  { %v3140_v5 = vadd.f32 %v2754_v51, %v474_v2 }
 0x6e3   :  { %511 = vrot.lane.b32.xlu0 %v3140_v5, %s2913_s1 }
 0x74d   :  { %v507_v6 = vpop.permute.xlu0 %506 }
 0x74e   :  { %v3144_v7 = vadd.f32 %v2752_v50, %v507_v6 }
 0x750   :  { %v515_v1 = vrot.slane %v3144_v7, 6 }
 0x752   :  { %516 = vrot.lane.b32.xlu1 %v515_v1, %s2916_s3 }
 0x755   :  { %v512_v9 = vpop.permute.xlu0 %511 }
 0x7c4   :  { %v517_v13 = vpop.permute.xlu1 %516 }
 0x7c5   :  { %v519_v14 = vsel %vm171_vm2, %v512_v9, %v517_v13 }
 0x7c6   :  { %v520_v16 = vsel %vm173_vm3, %v519_v14, 1.0 }
 0x7c7   :  { %v522_v17 = vrot.slane %v520_v16, 2 }
 0x7c9   :  { %2152 = vmatmul.mubr.msk.f32.vlgmr.msra.gmra.mrb[4].mxu0 %vm175_vm4, %v522_v17  ;;  %2336 = vmatmul.mubr.msk.f32.vlgmr.msra.gmra.mrb[4].mxu1 %vm175_vm4, %v522_v17 }
 0x7ca   :  { %2554 = vmatpush1.bf16.msra.mxu0 %v2987_v8  ;;  %2569 = vmatpush3.bf16.msra.mxu1 %v3068_v60 }
 0x7cb   :  { %2556 = vmatprep.subr.bf16.mxu0 %v2990_v12  ;;  %2570 = vmatprep.subr.bf16.mxu1 %v2914_v59 }
 0x7cc   :  { %809 = vmatprep.mubr.f32.mxu0 %v2911_v0  ;;  %2356 = vmatprep.mubr.msk.f32.mxu1 %vm2915_vm5, %v2911_v0 }
 0x7ce   :  { %2558 = vmatpush1.bf16.msra.mxu0 %v2993_v15  ;;  %2572 = vmatpush3.bf16.msra.mxu1 %v3071_v62 }
 0x7cf   :  { %2560 = vmatprep.subr.bf16.mxu0 %v3002_v18  ;;  %2573 = vmatprep.subr.bf16.mxu1 %v2914_v59 }
 0x7d2   :  { %2562 = vmatpush1.bf16.msra.mxu0 %v3009_v25  ;;  %2575 = vmatpush3.bf16.msra.mxu1 %v3075_v3 }
 0x7d3   :  { %2564 = vmatprep.subr.bf16.mxu0 %v3015_v27  ;;  %2576 = vmatprep.subr.bf16.mxu1 %v2914_v59 }
 0x7d6   :  { %2566 = vmatpush1.bf16.msra.mxu0 %v3020_v30  ;;  %2578 = vmatpush3.bf16.msra.mxu1 %v3080_v10 }
 0x7d7   :  { %2157 = vmatprep.subr.msk.mxu0 %vm179_vm1, %v3025_v31  ;;  %2354 = vmatprep.subr.mxu1 %v2911_v0 }
 0x7da   :  { %2158 = vmatpush1.msk.msra.mxu0 %vm179_vm1, %v3032_v32  ;;  %2355 = vmatpush3.msk.msra.mxu1 %vm179_vm1, %v3085_v11 }
 0x7db   :  { %2580 = vmatprep.subr.bf16.mxu0 %v2985_v4  ;;  %2595 = vmatprep.subr.bf16.mxu1 %v2914_v59 }
 0x89c   :  { %v591_v19 = vpop.f32.mrb[4].mxu0  ;;  %v662_v20 = vpop.f32.mrb[4].mxu1 }
 0x89d   :  { %v667_v21 = vrot.slane %v591_v19, 4  ;;  %709 = vrot.lane.b32.xlu1 %v662_v20, %s2913_s1  ;;  %v593_v22 = vpop.f32.mrb[5].mxu0  ;;  %v2337_v23 = vpop.f32.mrb[5].mxu1 }
 0x89e   :  { %v701_v24 = vadd.f32 %v662_v20, %v593_v22 }
 0x89f   :  { %676 = vrot.lane.b32.xlu0 %v667_v21, %s2913_s1  ;;  %v669_v26 = vadd.f32 %v667_v21, %v3060_v43 }
 0x8a0   :  { %v2156_v28 = vmul.f32 -1.442695, %v701_v24 }
 0x8a1   :  { %v2155_v29 = vmul.f32 -1.442695, %v669_v26 }
 0x8a2   :  { %2755 = vpow2.f32 %v2156_v28 }
 0x8a3   :  { %2757 = vpow2.f32 %v2155_v29 }
 0x8ac   :  { %v2756_v33 = vpop.eup %2755 }
 0x8ad   :  { %v2758_v34 = vpop.eup %2757  ;;  %v705_v35 = vadd.f32 1.0, %v2756_v33 }
 0x8ae   :  { %v673_v36 = vadd.f32 1.0, %v2758_v34 }
 0x8af   :  { %2759 = vrcp.f32 %v705_v35 }
 0x8b0   :  { %2761 = vrcp.f32 %v673_v36 }
 0x8b9   :  { %v2760_v37 = vpop.eup %2759 }
 0x8ba   :  { %v2762_v41 = vpop.eup %2761 }
 0x90f   :  { %v710_v38 = vpop.permute.xlu1 %709 }
 0x910   :  { %v712_v40 = vmul.f32 %v2760_v37, %v710_v38 }
 0x911   :  { %v677_v42 = vpop.permute.xlu0 %676 }
 0x912   :  { %v679_v44 = vmul.f32 %v2762_v41, %v677_v42  ;;  %714 = vrot.lane.b32.xlu1 %v712_v40, %s2913_s1 }
 0x914   :  { %681 = vrot.lane.b32.xlu0 %v679_v44, %s2913_s1 }
 0x984   :  { %v715_v45 = vpop.permute.xlu1 %714 }
 0x985   :  { %v717_v46 = vadd.f32 %v715_v45, %v593_v22 }
 0x986   :  { %v682_v47 = vpop.permute.xlu0 %681 }
 0x987   :  { %2763 = vtanh.f32 %v717_v46  ;;  %v684_v48 = vadd.f32 %v682_v47, %v3060_v43 }
 0x989   :  { %2765 = vtanh.f32 %v684_v48 }
 0x991   :  { %v2764_v49 = vpop.eup %2763 }
 0x992   :  { %v719_v50 = vsub.f32 %v3144_v7, %v2764_v49 }
 0x993   :  { %v2766_v51 = vpop.eup %2765 }
 0x994   :  { %721 = vrot.lane.b32.xlu0 %v719_v50, %s2916_s3  ;;  %v687_v52 = vrot.slane %v2766_v51, 2 }
 0x996   :  { %v689_v53 = vsub.f32 %v3140_v5, %v687_v52 }
 0x998   :  { %v691_v54 = vrot.slane %v689_v53, 6 }
 0x99a   :  { %692 = vrot.lane.b32.xlu1 %v691_v54, %s2916_s3 }
 0xa06   :  { %v722_v55 = vpop.permute.xlu0 %721 }
 0xa07   :  { %v724_v56 = vmul.f32 %v2760_v37, %v722_v55 }
 0xa09   :  { %726 = vrot.lane.b32.xlu0 %v724_v56, %s2912_s21 }
 0xa0c   :  { %v693_v57 = vpop.permute.xlu1 %692 }
 0xa0d   :  { %v695_v58 = vmul.f32 %v2762_v41, %v693_v57 }
 0xa0f   :  { %697 = vrot.lane.b32.xlu1 %v695_v58, %s2912_s21 }
 0xa7b   :  { %v727_v61 = vpop.permute.xlu0 %726 }
 0xa7c   :  { %v3190_v63 = vadd.f32 %v2764_v49, %v727_v61 }
 0xa7e   :  { %v735_v2 = vrot.slane %v3190_v63, 4 }
 0xa80   :  { %736 = vrot.lane.b32.xlu1 %v735_v2, %s2916_s3 }
 0xa81   :  { %v698_v6 = vpop.permute.xlu1 %697 }
 0xa82   :  { %v3194_v5 = vadd.f32 %v2766_v51, %v698_v6 }
 0xa84   :  { %731 = vrot.lane.b32.xlu0 %v3194_v5, %s2913_s1 }
 0xaf2   :  { %v737_v7 = vpop.permute.xlu1 %736 }
 0xaf6   :  { %v732_v1 = vpop.permute.xlu0 %731 }
 0xaf7   :  { %v739_v9 = vsel %vm171_vm2, %v732_v1, %v737_v7 }
 0xaf8   :  { %v740_v13 = vsel %vm173_vm3, %v739_v9, 1.0 }
 0xaf9   :  { %v742_v14 = vrot.slane %v740_v13, 4 }
 0xafb   :  { %2159 = vmatmul.mubr.msk.f32.vlgmr.msra.gmra.mrb[6].mxu0 %vm175_vm4, %v742_v14  ;;  %2357 = vmatmul.mubr.msk.f32.vlgmr.msra.gmra.mrb[6].mxu1 %vm175_vm4, %v742_v14 }
 0xafc   :  { %2582 = vmatpush1.bf16.msra.mxu0 %v2987_v8  ;;  %2597 = vmatpush3.bf16.msra.mxu1 %v3068_v60 }
 0xafd   :  { %2584 = vmatprep.subr.bf16.mxu0 %v2990_v12  ;;  %2598 = vmatprep.subr.bf16.mxu1 %v2914_v59 }
 0xafe   :  { %1029 = vmatprep.mubr.f32.mxu0 %v2911_v0  ;;  %2377 = vmatprep.mubr.msk.f32.mxu1 %vm2915_vm5, %v2911_v0 }
 0xb00   :  { %2586 = vmatpush1.bf16.msra.mxu0 %v2993_v15  ;;  %2600 = vmatpush3.bf16.msra.mxu1 %v3071_v62 }
 0xb01   :  { %2588 = vmatprep.subr.bf16.mxu0 %v3002_v18  ;;  %2601 = vmatprep.subr.bf16.mxu1 %v2914_v59 }
 0xb04   :  { %2590 = vmatpush1.bf16.msra.mxu0 %v3009_v25  ;;  %2603 = vmatpush3.bf16.msra.mxu1 %v3075_v3 }
 0xb05   :  { %2592 = vmatprep.subr.bf16.mxu0 %v3015_v27  ;;  %2604 = vmatprep.subr.bf16.mxu1 %v2914_v59 }
 0xb08   :  { %2594 = vmatpush1.bf16.msra.mxu0 %v3020_v30  ;;  %2606 = vmatpush3.bf16.msra.mxu1 %v3080_v10 }
 0xb09   :  { %2164 = vmatprep.subr.msk.mxu0 %vm179_vm1, %v3025_v31  ;;  %2375 = vmatprep.subr.mxu1 %v2911_v0 }
 0xb0c   :  { %2165 = vmatpush1.msk.msra.mxu0 %vm179_vm1, %v3032_v32  ;;  %2376 = vmatpush3.msk.msra.mxu1 %vm179_vm1, %v3085_v11 }
 0xb0d   :  { %2608 = vmatprep.subr.bf16.mxu0 %v2985_v4  ;;  %2623 = vmatprep.subr.bf16.mxu1 %v2914_v59 }
 0xbce   :  { %v811_v16 = vpop.f32.mrb[6].mxu0  ;;  %v882_v17 = vpop.f32.mrb[6].mxu1 }
 0xbcf   :  { %v887_v19 = vrot.slane %v811_v16, 2  ;;  %929 = vrot.lane.b32.xlu1 %v882_v17, %s2913_s1  ;;  %v813_v20 = vpop.f32.mrb[7].mxu0  ;;  %v2358_v21 = vpop.f32.mrb[7].mxu1 }
 0xbd0   :  { %v921_v22 = vadd.f32 %v882_v17, %v813_v20 }
 0xbd1   :  { %896 = vrot.lane.b32.xlu0 %v887_v19, %s2913_s1  ;;  %v889_v23 = vadd.f32 %v887_v19, %v3060_v43 }
 0xbd2   :  { %v2163_v24 = vmul.f32 -1.442695, %v921_v22 }
 0xbd3   :  { %v2162_v26 = vmul.f32 -1.442695, %v889_v23 }
 0xbd4   :  { %2767 = vpow2.f32 %v2163_v24 }
 0xbd5   :  { %2769 = vpow2.f32 %v2162_v26 }
 0xbde   :  { %v2768_v28 = vpop.eup %2767 }
 0xbdf   :  { %v2770_v29 = vpop.eup %2769  ;;  %v925_v33 = vadd.f32 1.0, %v2768_v28 }
 0xbe0   :  { %v893_v34 = vadd.f32 1.0, %v2770_v29 }
 0xbe1   :  { %2771 = vrcp.f32 %v925_v33 }
 0xbe2   :  { %2773 = vrcp.f32 %v893_v34 }
 0xbeb   :  { %v2772_v35 = vpop.eup %2771 }
 0xbec   :  { %v2774_v38 = vpop.eup %2773 }
 0xc41   :  { %v930_v36 = vpop.permute.xlu1 %929 }
 0xc42   :  { %v932_v37 = vmul.f32 %v2772_v35, %v930_v36 }
 0xc43   :  { %v897_v40 = vpop.permute.xlu0 %896 }
 0xc44   :  { %v899_v41 = vmul.f32 %v2774_v38, %v897_v40  ;;  %934 = vrot.lane.b32.xlu1 %v932_v37, %s2913_s1 }
 0xc46   :  { %901 = vrot.lane.b32.xlu0 %v899_v41, %s2913_s1 }
 0xcb6   :  { %v935_v42 = vpop.permute.xlu1 %934 }
 0xcb7   :  { %v937_v44 = vadd.f32 %v935_v42, %v813_v20 }
 0xcb8   :  { %v902_v45 = vpop.permute.xlu0 %901 }
 0xcb9   :  { %2775 = vtanh.f32 %v937_v44  ;;  %v904_v46 = vadd.f32 %v902_v45, %v3060_v43 }
 0xcbb   :  { %2777 = vtanh.f32 %v904_v46 }
 0xcc3   :  { %v2776_v47 = vpop.eup %2775 }
 0xcc4   :  { %v939_v48 = vsub.f32 %v3190_v63, %v2776_v47 }
 0xcc5   :  { %v2778_v49 = vpop.eup %2777 }
 0xcc6   :  { %941 = vrot.lane.b32.xlu0 %v939_v48, %s2916_s3  ;;  %v907_v50 = vrot.slane %v2778_v49, 2 }
 0xcc8   :  { %v909_v51 = vsub.f32 %v3194_v5, %v907_v50 }
 0xcca   :  { %v911_v52 = vrot.slane %v909_v51, 6 }
 0xccc   :  { %912 = vrot.lane.b32.xlu1 %v911_v52, %s2916_s3 }
 0xd38   :  { %v942_v53 = vpop.permute.xlu0 %941 }
 0xd39   :  { %v944_v54 = vmul.f32 %v2772_v35, %v942_v53 }
 0xd3b   :  { %946 = vrot.lane.b32.xlu0 %v944_v54, %s2912_s21 }
 0xd3e   :  { %v913_v55 = vpop.permute.xlu1 %912 }
 0xd3f   :  { %v915_v56 = vmul.f32 %v2774_v38, %v913_v55 }
 0xd41   :  { %917 = vrot.lane.b32.xlu1 %v915_v56, %s2912_s21 }
 0xdad   :  { %v947_v43 = vpop.permute.xlu0 %946 }
 0xdae   :  { %v3240_v57 = vadd.f32 %v2776_v47, %v947_v43 }
 0xdb0   :  { %v955_v58 = vrot.slane %v3240_v57, 2 }
 0xdb2   :  { %956 = vrot.lane.b32.xlu1 %v955_v58, %s2916_s3 }
 0xdb3   :  { %v918_v61 = vpop.permute.xlu1 %917 }
 0xdb4   :  { %v3244_v63 = vadd.f32 %v2778_v49, %v918_v61 }
 0xdb6   :  { %951 = vrot.lane.b32.xlu0 %v3244_v63, %s2913_s1 }
 0xe24   :  { %v957_v2 = vpop.permute.xlu1 %956 }
 0xe28   :  { %v952_v6 = vpop.permute.xlu0 %951 }
 0xe29   :  { %v959_v5 = vsel %vm171_vm2, %v952_v6, %v957_v2 }
 0xe2a   :  { %v960_v7 = vsel %vm173_vm3, %v959_v5, 1.0 }
 0xe2b   :  { %v962_v1 = vrot.slane %v960_v7, 6 }
 0xe2d   :  { %2166 = vmatmul.mubr.msk.f32.vlgmr.msra.gmra.mrb[8].mxu0 %vm175_vm4, %v962_v1  ;;  %2378 = vmatmul.mubr.msk.f32.vlgmr.msra.gmra.mrb[8].mxu1 %vm175_vm4, %v962_v1 }
 0xe2e   :  { %2610 = vmatpush1.bf16.msra.mxu0 %v2987_v8  ;;  %2625 = vmatpush3.bf16.msra.mxu1 %v3068_v60 }
 0xe2f   :  { %2612 = vmatprep.subr.bf16.mxu0 %v2990_v12  ;;  %2626 = vmatprep.subr.bf16.mxu1 %v2914_v59 }
 0xe30   :  { %1245 = vmatprep.mubr.f32.mxu0 %v2911_v0  ;;  %2398 = vmatprep.mubr.msk.f32.mxu1 %vm2915_vm5, %v2911_v0 }
 0xe32   :  { %2614 = vmatpush1.bf16.msra.mxu0 %v2993_v15  ;;  %2628 = vmatpush3.bf16.msra.mxu1 %v3071_v62 }
 0xe33   :  { %2616 = vmatprep.subr.bf16.mxu0 %v3002_v18  ;;  %2629 = vmatprep.subr.bf16.mxu1 %v2914_v59 }
 0xe36   :  { %2618 = vmatpush1.bf16.msra.mxu0 %v3009_v25  ;;  %2631 = vmatpush3.bf16.msra.mxu1 %v3075_v3 }
 0xe37   :  { %2620 = vmatprep.subr.bf16.mxu0 %v3015_v27  ;;  %2632 = vmatprep.subr.bf16.mxu1 %v2914_v59 }
 0xe3a   :  { %2622 = vmatpush1.bf16.msra.mxu0 %v3020_v30  ;;  %2634 = vmatpush3.bf16.msra.mxu1 %v3080_v10 }
 0xe3b   :  { %2171 = vmatprep.subr.msk.mxu0 %vm179_vm1, %v3025_v31  ;;  %2396 = vmatprep.subr.mxu1 %v2911_v0 }
 0xe3e   :  { %2172 = vmatpush1.msk.msra.mxu0 %vm179_vm1, %v3032_v32  ;;  %2397 = vmatpush3.msk.msra.mxu1 %vm179_vm1, %v3085_v11 }
 0xe3f   :  { %2636 = vmatprep.subr.bf16.mxu0 %v2985_v4  ;;  %2651 = vmatprep.subr.bf16.mxu1 %v2914_v59 }
 0xf00   :  { %v1031_v9 = vpop.f32.mrb[8].mxu0  ;;  %v1102_v13 = vpop.f32.mrb[8].mxu1 }
 0xf01   :  { %1147 = vrot.lane.b32.xlu1 %v1102_v13, %s2913_s1  ;;  %v2379_v14 = vpop.f32.mrb[9].mxu1  ;;  %1114 = vrot.lane.b32.xlu0 %v1031_v9, %s2913_s1  ;;  %v1033_v16 = vpop.f32.mrb[9].mxu0  ;;  %v1106_v19 = vadd.f32 %v1031_v9, %v3057_v39 }
 0xf02   :  { %v1139_v17 = vadd.f32 %v1102_v13, %v1033_v16 }
 0xf03   :  { %v2169_v20 = vmul.f32 -1.442695, %v1106_v19 }
 0xf04   :  { %v2170_v21 = vmul.f32 -1.442695, %v1139_v17 }
 0xf05   :  { %2779 = vpow2.f32 %v2169_v20 }
 0xf06   :  { %2781 = vpow2.f32 %v2170_v21 }
 0xf0f   :  { %v2780_v22 = vpop.eup %2779 }
 0xf10   :  { %v2782_v23 = vpop.eup %2781  ;;  %v1110_v24 = vadd.f32 1.0, %v2780_v22 }
 0xf11   :  { %v1143_v26 = vadd.f32 1.0, %v2782_v23 }
 0xf12   :  { %2783 = vrcp.f32 %v1110_v24 }
 0xf13   :  { %2785 = vrcp.f32 %v1143_v26 }
 0xf1c   :  { %v2784_v28 = vpop.eup %2783 }
 0xf1d   :  { %v2786_v29 = vpop.eup %2785 }
 0xf73   :  { %v1148_v33 = vpop.permute.xlu1 %1147  ;;  %v1115_v34 = vpop.permute.xlu0 %1114 }
 0xf74   :  { %v1150_v35 = vmul.f32 %v2786_v29, %v1148_v33  ;;  %v1117_v36 = vmul.f32 %v2784_v28, %v1115_v34 }
 0xf76   :  { %1119 = vrot.lane.b32.xlu0 %v1117_v36, %s2913_s1  ;;  %1152 = vrot.lane.b32.xlu1 %v1150_v35, %s2913_s1 }
 0xfe8   :  { %v1120_v37 = vpop.permute.xlu0 %1119  ;;  %v1153_v38 = vpop.permute.xlu1 %1152 }
 0xfe9   :  { %v1122_v40 = vadd.f32 %v1120_v37, %v3057_v39  ;;  %v1155_v41 = vadd.f32 %v1153_v38, %v1033_v16 }
 0xfeb   :  { %2787 = vtanh.f32 %v1122_v40 }
 0xfec   :  { %2789 = vtanh.f32 %v1155_v41 }
 0xff5   :  { %v2788_v42 = vpop.eup %2787 }
 0xff6   :  { %v2790_v44 = vpop.eup %2789  ;;  %v1125_v45 = vrot.slane %v2788_v42, 2 }
 0xff7   :  { %v1157_v46 = vsub.f32 %v3240_v57, %v2790_v44 }
 0xff8   :  { %v1127_v47 = vsub.f32 %v3244_v63, %v1125_v45 }
 0xff9   :  { %1159 = vrot.lane.b32.xlu1 %v1157_v46, %s2916_s3 }
 0xffa   :  { %v1129_v48 = vrot.slane %v1127_v47, 6 }
 0xffc   :  { %1130 = vrot.lane.b32.xlu0 %v1129_v48, %s2916_s3 }
0x106b   :  { %v1160_v49 = vpop.permute.xlu1 %1159 }
0x106c   :  { %v1162_v50 = vmul.f32 %v2786_v29, %v1160_v49 }
0x106e   :  { %1164 = vrot.lane.b32.xlu1 %v1162_v50, %s2912_s21  ;;  %v1131_v51 = vpop.permute.xlu0 %1130 }
0x106f   :  { %v1133_v52 = vmul.f32 %v2784_v28, %v1131_v51 }
0x1071   :  { %1135 = vrot.lane.b32.xlu0 %v1133_v52, %s2912_s21 }
0x10e0   :  { %v1165_v53 = vpop.permute.xlu1 %1164 }
0x10e1   :  { %v3290_v54 = vadd.f32 %v2790_v44, %v1165_v53 }
0x10e3   :  { %1173 = vrot.lane.b32.xlu1 %v3290_v54, %s2916_s3  ;;  %v1136_v55 = vpop.permute.xlu0 %1135 }
0x10e4   :  { %v3294_v56 = vadd.f32 %v2788_v42, %v1136_v55 }
0x10e6   :  { %1169 = vrot.lane.b32.xlu0 %v3294_v56, %s2913_s1 }
0x1155   :  { %v1174_v43 = vpop.permute.xlu1 %1173 }
0x1158   :  { %v1170_v57 = vpop.permute.xlu0 %1169 }
0x1159   :  { %v1176_v58 = vsel %vm171_vm2, %v1170_v57, %v1174_v43  ;;  %v3374_v43 = vld [vmem:[#allocation2 + $0xc0] sm:$0x1] }
0x115a   :  { %v1177_v61 = vsel %vm173_vm3, %v1176_v58, 1.0 }
0x115b   :  { %2173 = vmatmul.mubr.msk.f32.vlgmr.msra.gmra.mrb[10].mxu0 %vm175_vm4, %v1177_v61  ;;  %2399 = vmatmul.mubr.msk.f32.vlgmr.msra.gmra.mrb[10].mxu1 %vm175_vm4, %v1177_v61 }
0x115c   :  { %2638 = vmatpush1.bf16.msra.mxu0 %v2987_v8  ;;  %2653 = vmatpush3.bf16.msra.mxu1 %v3068_v60 }
0x115d   :  { %2640 = vmatprep.subr.bf16.mxu0 %v2990_v12  ;;  %2654 = vmatprep.subr.bf16.mxu1 %v2914_v59 }
0x115e   :  { %1465 = vmatprep.mubr.f32.mxu0 %v2911_v0  ;;  %2419 = vmatprep.mubr.msk.f32.mxu1 %vm2915_vm5, %v2911_v0 }
0x1160   :  { %2642 = vmatpush1.bf16.msra.mxu0 %v2993_v15  ;;  %2656 = vmatpush3.bf16.msra.mxu1 %v3071_v62 }
0x1161   :  { %2644 = vmatprep.subr.bf16.mxu0 %v3002_v18  ;;  %2657 = vmatprep.subr.bf16.mxu1 %v2914_v59 }
0x1164   :  { %2646 = vmatpush1.bf16.msra.mxu0 %v3009_v25  ;;  %2659 = vmatpush3.bf16.msra.mxu1 %v3075_v3 }
0x1165   :  { %2648 = vmatprep.subr.bf16.mxu0 %v3015_v27  ;;  %2660 = vmatprep.subr.bf16.mxu1 %v2914_v59 }
0x1168   :  { %2650 = vmatpush1.bf16.msra.mxu0 %v3020_v30  ;;  %2662 = vmatpush3.bf16.msra.mxu1 %v3080_v10 }
0x1169   :  { %2178 = vmatprep.subr.msk.mxu0 %vm179_vm1, %v3025_v31  ;;  %2417 = vmatprep.subr.mxu1 %v2911_v0 }
0x116c   :  { %2179 = vmatpush1.msk.msra.mxu0 %vm179_vm1, %v3032_v32  ;;  %2418 = vmatpush3.msk.msra.mxu1 %vm179_vm1, %v3085_v11 }
0x116d   :  { %2664 = vmatprep.subr.bf16.mxu0 %v2985_v4  ;;  %2679 = vmatprep.subr.bf16.mxu1 %v2914_v59 }
0x122e   :  { %v1247_v63 = vpop.f32.mrb[10].mxu0  ;;  %v1318_v2 = vpop.f32.mrb[10].mxu1 }
0x122f   :  { %v1323_v6 = vrot.slane %v1247_v63, 6  ;;  %1365 = vrot.lane.b32.xlu1 %v1318_v2, %s2913_s1  ;;  %v1249_v5 = vpop.f32.mrb[11].mxu0  ;;  %v2400_v7 = vpop.f32.mrb[11].mxu1 }
0x1230   :  { %v1357_v31 = vadd.f32 %v1318_v2, %v1249_v5 }
0x1231   :  { %1332 = vrot.lane.b32.xlu0 %v1323_v6, %s2913_s1  ;;  %v1325_v1 = vadd.f32 %v1323_v6, %v3057_v39 }
0x1232   :  { %v2177_v32 = vmul.f32 -1.442695, %v1357_v31 }
0x1233   :  { %v2176_v9 = vmul.f32 -1.442695, %v1325_v1 }
0x1234   :  { %2791 = vpow2.f32 %v2177_v32 }
0x1235   :  { %2793 = vpow2.f32 %v2176_v9 }
0x123e   :  { %v2792_v13 = vpop.eup %2791 }
0x123f   :  { %v2794_v14 = vpop.eup %2793  ;;  %v1361_v16 = vadd.f32 1.0, %v2792_v13 }
0x1240   :  { %v1329_v17 = vadd.f32 1.0, %v2794_v14 }
0x1241   :  { %2795 = vrcp.f32 %v1361_v16 }
0x1242   :  { %2797 = vrcp.f32 %v1329_v17 }
0x124b   :  { %v2796_v19 = vpop.eup %2795 }
0x124c   :  { %v2798_v22 = vpop.eup %2797 }
0x12a1   :  { %v1366_v20 = vpop.permute.xlu1 %1365 }
0x12a2   :  { %v1368_v21 = vmul.f32 %v2796_v19, %v1366_v20 }
0x12a3   :  { %v1333_v23 = vpop.permute.xlu0 %1332 }
0x12a4   :  { %v1335_v24 = vmul.f32 %v2798_v22, %v1333_v23  ;;  %1370 = vrot.lane.b32.xlu1 %v1368_v21, %s2913_s1 }
0x12a6   :  { %1337 = vrot.lane.b32.xlu0 %v1335_v24, %s2913_s1 }
0x1316   :  { %v1371_v26 = vpop.permute.xlu1 %1370 }
0x1317   :  { %v1373_v28 = vadd.f32 %v1371_v26, %v1249_v5 }
0x1318   :  { %v1338_v29 = vpop.permute.xlu0 %1337 }
0x1319   :  { %2799 = vtanh.f32 %v1373_v28  ;;  %v1340_v33 = vadd.f32 %v1338_v29, %v3057_v39 }
0x131b   :  { %2801 = vtanh.f32 %v1340_v33 }
0x1323   :  { %v2800_v34 = vpop.eup %2799 }
0x1324   :  { %v1375_v35 = vsub.f32 %v3290_v54, %v2800_v34 }
0x1325   :  { %v2802_v36 = vpop.eup %2801 }
0x1326   :  { %1377 = vrot.lane.b32.xlu0 %v1375_v35, %s2916_s3  ;;  %v1343_v37 = vrot.slane %v2802_v36, 2 }
0x1328   :  { %v1345_v38 = vsub.f32 %v3294_v56, %v1343_v37  ;;  %v3369_v56 = vld [vmem:[#allocation2 + $0xc8] sm:$0x1] }
0x132a   :  { %v1347_v40 = vrot.slane %v1345_v38, 6 }
0x132c   :  { %1348 = vrot.lane.b32.xlu1 %v1347_v40, %s2916_s3 }
0x1398   :  { %v1378_v41 = vpop.permute.xlu0 %1377 }
0x1399   :  { %v1380_v42 = vmul.f32 %v2796_v19, %v1378_v41 }
0x139b   :  { %1382 = vrot.lane.b32.xlu0 %v1380_v42, %s2912_s21 }
0x139e   :  { %v1349_v44 = vpop.permute.xlu1 %1348 }
0x139f   :  { %v1351_v45 = vmul.f32 %v2798_v22, %v1349_v44 }
0x13a1   :  { %1353 = vrot.lane.b32.xlu1 %v1351_v45, %s2912_s21 }
0x140d   :  { %v1383_v46 = vpop.permute.xlu0 %1382 }
0x140e   :  { %v3340_v47 = vadd.f32 %v2800_v34, %v1383_v46 }
0x1410   :  { %v1391_v48 = vrot.slane %v3340_v47, 6 }
0x1412   :  { %1392 = vrot.lane.b32.xlu1 %v1391_v48, %s2916_s3 }
0x1413   :  { %v1354_v49 = vpop.permute.xlu1 %1353 }
0x1414   :  { %v3344_v50 = vadd.f32 %v2802_v36, %v1354_v49 }
0x1416   :  { %1387 = vrot.lane.b32.xlu0 %v3344_v50, %s2913_s1 }
0x1484   :  { %v1393_v51 = vpop.permute.xlu1 %1392 }
0x1488   :  { %v1388_v52 = vpop.permute.xlu0 %1387 }
0x1489   :  { %v1395_v53 = vsel %vm171_vm2, %v1388_v52, %v1393_v51 }
0x148a   :  { %v1396_v54 = vsel %vm173_vm3, %v1395_v53, 1.0 }
0x148b   :  { %v1398_v55 = vrot.slane %v1396_v54, 2 }
0x148d   :  { %2180 = vmatmul.mubr.msk.f32.vlgmr.msra.gmra.mrb[12].mxu0 %vm175_vm4, %v1398_v55  ;;  %2420 = vmatmul.mubr.msk.f32.vlgmr.msra.gmra.mrb[12].mxu1 %vm175_vm4, %v1398_v55 }
0x148e   :  { %2666 = vmatpush1.bf16.msra.mxu0 %v2987_v8  ;;  %2681 = vmatpush3.bf16.msra.mxu1 %v3068_v60 }
0x148f   :  { %2668 = vmatprep.subr.bf16.mxu0 %v2990_v12  ;;  %2682 = vmatprep.subr.bf16.mxu1 %v2914_v59 }
0x1490   :  { %1685 = vmatprep.mubr.f32.mxu0 %v2911_v0  ;;  %2440 = vmatprep.mubr.msk.f32.mxu1 %vm2915_vm5, %v2911_v0 }
0x1492   :  { %2670 = vmatpush1.bf16.msra.mxu0 %v2993_v15  ;;  %2684 = vmatpush3.bf16.msra.mxu1 %v3071_v62 }
0x1493   :  { %2672 = vmatprep.subr.bf16.mxu0 %v3002_v18  ;;  %2685 = vmatprep.subr.bf16.mxu1 %v2914_v59 }
0x1496   :  { %2674 = vmatpush1.bf16.msra.mxu0 %v3009_v25  ;;  %2687 = vmatpush3.bf16.msra.mxu1 %v3075_v3 }
0x1497   :  { %2676 = vmatprep.subr.bf16.mxu0 %v3015_v27  ;;  %2688 = vmatprep.subr.bf16.mxu1 %v2914_v59 }
0x149a   :  { %2678 = vmatpush1.bf16.msra.mxu0 %v3020_v30  ;;  %2690 = vmatpush3.bf16.msra.mxu1 %v3080_v10 }
0x149b   :  { %2185 = vmatprep.subr.msk.mxu0 %vm179_vm1, %v3369_v56  ;;  %2438 = vmatprep.subr.mxu1 %v2911_v0 }
0x149e   :  { %2186 = vmatpush1.msk.msra.mxu0 %vm179_vm1, %v3374_v43  ;;  %2439 = vmatpush3.msk.msra.mxu1 %vm179_vm1, %v3085_v11 }
0x149f   :  { %2692 = vmatprep.subr.bf16.mxu0 %v2985_v4  ;;  %2707 = vmatprep.subr.bf16.mxu1 %v2914_v59 }
0x1560   :  { %v1467_v57 = vpop.f32.mrb[12].mxu0  ;;  %v1538_v58 = vpop.f32.mrb[12].mxu1 }
0x1561   :  { %v1543_v61 = vrot.slane %v1467_v57, 4  ;;  %1585 = vrot.lane.b32.xlu1 %v1538_v58, %s2913_s1  ;;  %v1469_v63 = vpop.f32.mrb[13].mxu0  ;;  %v2421_v2 = vpop.f32.mrb[13].mxu1 }
0x1562   :  { %v1577_v6 = vadd.f32 %v1538_v58, %v1469_v63 }
0x1563   :  { %1552 = vrot.lane.b32.xlu0 %v1543_v61, %s2913_s1  ;;  %v1545_v5 = vadd.f32 %v1543_v61, %v3057_v39 }
0x1564   :  { %v2184_v7 = vmul.f32 -1.442695, %v1577_v6 }
0x1565   :  { %v2183_v31 = vmul.f32 -1.442695, %v1545_v5 }
0x1566   :  { %2803 = vpow2.f32 %v2184_v7 }
0x1567   :  { %2805 = vpow2.f32 %v2183_v31 }
0x1570   :  { %v2804_v11 = vpop.eup %2803 }
0x1571   :  { %v2806_v4 = vpop.eup %2805  ;;  %v1581_v1 = vadd.f32 1.0, %v2804_v11 }
0x1572   :  { %v1549_v32 = vadd.f32 1.0, %v2806_v4 }
0x1573   :  { %2807 = vrcp.f32 %v1581_v1 }
0x1574   :  { %2809 = vrcp.f32 %v1549_v32 }
0x157d   :  { %v2808_v9 = vpop.eup %2807 }
0x157e   :  { %v2810_v16 = vpop.eup %2809 }
0x15d3   :  { %v1586_v13 = vpop.permute.xlu1 %1585 }
0x15d4   :  { %v1588_v14 = vmul.f32 %v2808_v9, %v1586_v13 }
0x15d5   :  { %v1553_v17 = vpop.permute.xlu0 %1552 }
0x15d6   :  { %v1555_v19 = vmul.f32 %v2810_v16, %v1553_v17  ;;  %1590 = vrot.lane.b32.xlu1 %v1588_v14, %s2913_s1 }
0x15d8   :  { %1557 = vrot.lane.b32.xlu0 %v1555_v19, %s2913_s1 }
0x1648   :  { %v1591_v20 = vpop.permute.xlu1 %1590 }
0x1649   :  { %v1593_v21 = vadd.f32 %v1591_v20, %v1469_v63 }
0x164a   :  { %v1558_v22 = vpop.permute.xlu0 %1557 }
0x164b   :  { %2811 = vtanh.f32 %v1593_v21  ;;  %v1560_v23 = vadd.f32 %v1558_v22, %v3057_v39 }
0x164d   :  { %2813 = vtanh.f32 %v1560_v23 }
0x1655   :  { %v2812_v24 = vpop.eup %2811 }
0x1656   :  { %v1595_v26 = vsub.f32 %v3340_v47, %v2812_v24 }
0x1657   :  { %v2814_v28 = vpop.eup %2813 }
0x1658   :  { %1597 = vrot.lane.b32.xlu0 %v1595_v26, %s2916_s3  ;;  %v1563_v29 = vrot.slane %v2814_v28, 2 }
0x165a   :  { %v1565_v33 = vsub.f32 %v3344_v50, %v1563_v29 }
0x165c   :  { %v1567_v34 = vrot.slane %v1565_v33, 6 }
0x165e   :  { %1568 = vrot.lane.b32.xlu1 %v1567_v34, %s2916_s3 }
0x16ca   :  { %v1598_v35 = vpop.permute.xlu0 %1597 }
0x16cb   :  { %v1600_v36 = vmul.f32 %v2808_v9, %v1598_v35 }
0x16cd   :  { %1602 = vrot.lane.b32.xlu0 %v1600_v36, %s2912_s21 }
0x16d0   :  { %v1569_v37 = vpop.permute.xlu1 %1568 }
0x16d1   :  { %v1571_v38 = vmul.f32 %v2810_v16, %v1569_v37 }
0x16d3   :  { %1573 = vrot.lane.b32.xlu1 %v1571_v38, %s2912_s21 }
0x173f   :  { %v1603_v40 = vpop.permute.xlu0 %1602 }
0x1740   :  { %v3394_v41 = vadd.f32 %v2812_v24, %v1603_v40 }
0x1742   :  { %v1611_v42 = vrot.slane %v3394_v41, 4 }
0x1744   :  { %1612 = vrot.lane.b32.xlu1 %v1611_v42, %s2916_s3 }
0x1745   :  { %v1574_v44 = vpop.permute.xlu1 %1573 }
0x1746   :  { %v3398_v45 = vadd.f32 %v2814_v28, %v1574_v44 }
0x1748   :  { %1607 = vrot.lane.b32.xlu0 %v3398_v45, %s2913_s1 }
0x17b6   :  { %v1613_v46 = vpop.permute.xlu1 %1612 }
0x17ba   :  { %v1608_v47 = vpop.permute.xlu0 %1607 }
0x17bb   :  { %v1615_v48 = vsel %vm171_vm2, %v1608_v47, %v1613_v46  ;;  %v2010_v47 = vld [vmem:[%s3503_s5] sm:$0xff] }
0x17bc   :  { %v1616_v49 = vsel %vm173_vm3, %v1615_v48, 1.0  ;;  %v2011_v48 = vld [vmem:[%s3503_s5 + $0x8] sm:$0xff] }
0x17bd   :  { %v1618_v50 = vrot.slane %v1616_v49, 4  ;;  %v2012_v49 = vld [vmem:[%s3503_s5 + $0x10] sm:$0xff] }
0x17bf   :  { %2187 = vmatmul.mubr.msk.f32.vlgmr.msra.gmra.mrb[14].mxu0 %vm175_vm4, %v1618_v50  ;;  %2441 = vmatmul.mubr.msk.f32.vlgmr.msra.gmra.mrb[14].mxu1 %vm175_vm4, %v1618_v50  ;;  %v2720_v50 = vpack.c.bf16 %v2011_v48, %v2010_v47 }
0x17c0   :  { %2694 = vmatpush1.bf16.msra.mxu0 %v2987_v8  ;;  %2709 = vmatpush3.bf16.msra.mxu1 %v3068_v60  ;;  %v2835_v8 = vld [vmem:[#allocation2 + $0xd0] sm:$0x1] }
0x17c1   :  { %2696 = vmatprep.subr.bf16.mxu0 %v2990_v12  ;;  %2710 = vmatprep.subr.bf16.mxu1 %v2914_v59 }
0x17c2   :  { %1905 = vmatprep.mubr.f32.mxu0 %v2911_v0  ;;  %2461 = vmatprep.mubr.msk.f32.mxu1 %vm2915_vm5, %v2911_v0 }
0x17c4   :  { %2698 = vmatpush1.bf16.msra.mxu0 %v2993_v15  ;;  %2712 = vmatpush3.bf16.msra.mxu1 %v3071_v62 }
0x17c5   :  { %2700 = vmatprep.subr.bf16.mxu0 %v3002_v18  ;;  %2713 = vmatprep.subr.bf16.mxu1 %v2914_v59 }
0x17c8   :  { %2702 = vmatpush1.bf16.msra.mxu0 %v3009_v25  ;;  %2715 = vmatpush3.bf16.msra.mxu1 %v3075_v3 }
0x17c9   :  { %2704 = vmatprep.subr.bf16.mxu0 %v3015_v27  ;;  %2716 = vmatprep.subr.bf16.mxu1 %v2914_v59 }
0x17cc   :  { %2706 = vmatpush1.bf16.msra.mxu0 %v3020_v30  ;;  %2718 = vmatpush3.bf16.msra.mxu1 %v3080_v10 }
0x17cd   :  { %2192 = vmatprep.subr.msk.mxu0 %vm179_vm1, %v3369_v56  ;;  %2459 = vmatprep.subr.mxu1 %v2911_v0 }
0x17d0   :  { %2193 = vmatpush1.msk.msra.mxu0 %vm179_vm1, %v3374_v43  ;;  %2460 = vmatpush3.msk.msra.mxu1 %vm179_vm1, %v2835_v8  ;;  %v2013_v8 = vld [vmem:[%s3503_s5 + $0x18] sm:$0xff]  ;;  %s2119_s5 = sshll.u32 %s2917_s17, 4  ;;  %s2120_s5 = int_to_ptr.vmem [resolvable:$true] %s2119_s5 }
0x17d1   :  { %2719 = vmatprep.subr.bf16.mxu0 %v2914_v59  ;;  %s2858_s18 = scalar_lea.vmem %s2120_s5, 64  ;;  %p2863_p9 = scmp.lt.s32.totalorder %s2120_s5, %s2120_s5 }
0x17d2   :  { %p2859_p8 = scmp.ne.s32.totalorder %s2120_s5, %s2858_s18  ;;  %p2864_p10 = scmp.lt.s32.totalorder %s2858_s18, %s2858_s18 }
0x17d4   :  { %p2865_p11 = por %p2864_p10, %p2863_p9 }
0x17d6   :  { %p2866_p12 = pnand %p2865_p11, %p2859_p8 }
0x1892   :  { %v1687_v12 = vpop.f32.mrb[14].mxu0  ;;  %v1758_v15 = vpop.f32.mrb[14].mxu1 }
0x1893   :  { %v1763_v18 = vrot.slane %v1687_v12, 2  ;;  %1805 = vrot.lane.b32.xlu1 %v1758_v15, %s2913_s1  ;;  %v1689_v25 = vpop.f32.mrb[15].mxu0  ;;  %v2442_v27 = vpop.f32.mrb[15].mxu1  ;;  %v2723_v12 = vpack.c.bf16 %v2013_v8, %v2012_v49 }
0x1894   :  { %v1797_v30 = vadd.f32 %v1758_v15, %v1689_v25 }
0x1895   :  { %1772 = vrot.lane.b32.xlu0 %v1763_v18, %s2913_s1  ;;  %v1765_v60 = vadd.f32 %v1763_v18, %v3057_v39 }
0x1896   :  { %v2191_v62 = vmul.f32 -1.442695, %v1797_v30 }
0x1897   :  { %v2190_v3 = vmul.f32 -1.442695, %v1765_v60 }
0x1898   :  { %2815 = vpow2.f32 %v2191_v62 }
0x1899   :  { %2817 = vpow2.f32 %v2190_v3 }
0x18a2   :  { %v2816_v10 = vpop.eup %2815 }
0x18a3   :  { %v2818_v51 = vpop.eup %2817  ;;  %v1801_v52 = vadd.f32 1.0, %v2816_v10 }
0x18a4   :  { %v1769_v53 = vadd.f32 1.0, %v2818_v51 }
0x18a5   :  { %2819 = vrcp.f32 %v1801_v52 }
0x18a6   :  { %2821 = vrcp.f32 %v1769_v53 }
0x18af   :  { %v2820_v54 = vpop.eup %2819 }
0x18b0   :  { %v2822_v43 = vpop.eup %2821 }
0x1905   :  { %v1806_v55 = vpop.permute.xlu1 %1805 }
0x1906   :  { %v1808_v56 = vmul.f32 %v2820_v54, %v1806_v55 }
0x1907   :  { %v1773_v57 = vpop.permute.xlu0 %1772 }
0x1908   :  { %v1775_v58 = vmul.f32 %v2822_v43, %v1773_v57  ;;  %1810 = vrot.lane.b32.xlu1 %v1808_v56, %s2913_s1 }
0x190a   :  { %1777 = vrot.lane.b32.xlu0 %v1775_v58, %s2913_s1 }
0x197a   :  { %v1811_v61 = vpop.permute.xlu1 %1810 }
0x197b   :  { %v1813_v63 = vadd.f32 %v1811_v61, %v1689_v25 }
0x197c   :  { %v1778_v2 = vpop.permute.xlu0 %1777 }
0x197d   :  { %2823 = vtanh.f32 %v1813_v63  ;;  %v1780_v6 = vadd.f32 %v1778_v2, %v3057_v39 }
0x197f   :  { %2825 = vtanh.f32 %v1780_v6 }
0x1987   :  { %v2824_v5 = vpop.eup %2823 }
0x1988   :  { %v1815_v7 = vsub.f32 %v3394_v41, %v2824_v5 }
0x1989   :  { %v2826_v31 = vpop.eup %2825 }
0x198a   :  { %1817 = vrot.lane.b32.xlu0 %v1815_v7, %s2916_s3  ;;  %v1783_v11 = vrot.slane %v2826_v31, 2 }
0x198c   :  { %v1785_v4 = vsub.f32 %v3398_v45, %v1783_v11 }
0x198e   :  { %v1787_v1 = vrot.slane %v1785_v4, 6 }
0x1990   :  { %1788 = vrot.lane.b32.xlu1 %v1787_v1, %s2916_s3 }
0x19fc   :  { %v1818_v32 = vpop.permute.xlu0 %1817 }
0x19fd   :  { %v1820_v9 = vmul.f32 %v2820_v54, %v1818_v32 }
0x19ff   :  { %1822 = vrot.lane.b32.xlu0 %v1820_v9, %s2912_s21 }
0x1a02   :  { %v1789_v13 = vpop.permute.xlu1 %1788 }
0x1a03   :  { %v1791_v14 = vmul.f32 %v2822_v43, %v1789_v13 }
0x1a05   :  { %1793 = vrot.lane.b32.xlu1 %v1791_v14, %s2912_s21 }
0x1a71   :  { %v1823_v39 = vpop.permute.xlu0 %1822 }
0x1a72   :  { %v1825_v16 = vadd.f32 %v2824_v5, %v1823_v39 }
0x1a74   :  { %v1831_v17 = vrot.slane %v1825_v16, 2 }
0x1a76   :  { %1832 = vrot.lane.b32.xlu1 %v1831_v17, %s2916_s3 }
0x1a77   :  { %v1794_v19 = vpop.permute.xlu1 %1793 }
0x1a78   :  { %v1796_v20 = vadd.f32 %v2826_v31, %v1794_v19 }
0x1a7a   :  { %1827 = vrot.lane.b32.xlu0 %v1796_v20, %s2913_s1 }
0x1ae8   :  { %v1833_v21 = vpop.permute.xlu1 %1832 }
0x1aec   :  { %v1828_v22 = vpop.permute.xlu0 %1827 }
0x1aed   :  { %v1835_v23 = vsel %vm171_vm2, %v1828_v22, %v1833_v21  ;;  %2099 = vst.msk [vmem:[#allocation6 - $0x6] sm:$0xc0] %vm2098_vm6, %v1828_v22 }
0x1aee   :  { %v1836_v24 = vsel %vm173_vm3, %v1835_v23, 1.0 }
0x1aef   :  { %v1838_v26 = vrot.slane %v1836_v24, 6 }
0x1af1   :  { %2194 = vmatmul.mubr.msk.f32.vlgmr.msra.gmra.mrb[16].mxu0 %vm175_vm4, %v1838_v26  ;;  %2462 = vmatmul.mubr.msk.f32.vlgmr.msra.gmra.mrb[16].mxu1 %vm175_vm4, %v1838_v26 }
0x1af2   :  { %2472 = vmatprep.mubr.msk.f32.mxu0 %vm2915_vm5, %v2911_v0  ;;  %2721 = vmatpush3.bf16.msra.mxu0 %v2720_v50 }
0x1af3   :  { %2722 = vmatprep.subr.bf16.mxu0 %v2914_v59 }
0x1af6   :  { %2724 = vmatpush3.bf16.msra.mxu0 %v2723_v12 }
0x1bc4   :  { %v1907_v28 = vpop.f32.mrb[16].mxu0  ;;  %v1977_v29 = vpop.f32.mrb[16].mxu1 }
0x1bc5   :  { %1989 = vrot.lane.b32.xlu0 %v1977_v29, %s2913_s1  ;;  %v1908_v33 = vpop.f32.mrb[17].mxu0  ;;  %v2463_v34 = vpop.f32.mrb[17].mxu1 }
0x1bc6   :  { %v1981_v35 = vadd.f32 %v1977_v29, %v1908_v33 }
0x1bc8   :  { %v2197_v36 = vmul.f32 -1.442695, %v1981_v35 }
0x1bca   :  { %2827 = vpow2.f32 %v2197_v36 }
0x1bd4   :  { %v2828_v37 = vpop.eup %2827 }
0x1bd5   :  { %v1985_v38 = vadd.f32 1.0, %v2828_v37 }
0x1bd7   :  { %2829 = vrcp.f32 %v1985_v38 }
0x1be1   :  { %v2830_v40 = vpop.eup %2829 }
0x1c37   :  { %v1990_v41 = vpop.permute.xlu0 %1989 }
0x1c38   :  { %v1992_v42 = vmul.f32 %v2830_v40, %v1990_v41 }
0x1c3a   :  { %1994 = vrot.lane.b32.xlu1 %v1992_v42, %s2913_s1 }
0x1cac   :  { %v1995_v44 = vpop.permute.xlu1 %1994 }
0x1cad   :  { %v1997_v45 = vadd.f32 %v1995_v44, %v1908_v33 }
0x1caf   :  { %2831 = vtanh.f32 %v1997_v45 }
0x1cb9   :  { %v2832_v0 = vpop.eup %2831 }
0x1cba   :  { %v1999_v46 = vsub.f32 %v1825_v16, %v2832_v0 }
0x1cbc   :  { %2001 = vrot.lane.b32.xlu0 %v1999_v46, %s2916_s3 }
0x1d2e   :  { %v2002_v15 = vpop.permute.xlu0 %2001 }
0x1d2f   :  { %v2004_v18 = vmul.f32 %v2830_v40, %v2002_v15 }
0x1d31   :  { %2006 = vrot.lane.b32.xlu1 %v2004_v18, %s2912_s21 }
0x1da3   :  { %v2007_v25 = vpop.permute.xlu1 %2006 }
0x1da4   :  { %v2009_v27 = vadd.f32 %v2832_v0, %v2007_v25 }
0x1da6   :  { %2022 = vrot.lane.b32.xlu0 %v2009_v27, %s2913_s1 }
0x1e18   :  { %v2023_v30 = vpop.permute.xlu0 %2022 }
0x1e19   :  { %2103 = vst.msk [vmem:[#allocation6 + $0x2] sm:$0x3] %vm2102_vm7, %v2023_v30  ;;  %2473 = vmatmul.mubr.msk.f32.vlgmr.msra.gmra.mrb[18].mxu0 %vm171_vm2, %v2023_v30 }
0x1e1a   :  { %2869 = shalt.err (!%p2866_p12)
}
0x1e1b   :  { %s2870_s4 = scalar_lea.hbm %s3506_s8, 64 }
0x1e1c   :  { %p2871_p13 = scmp.ne.s32.totalorder %s3506_s8, %s2870_s4  ;;  %p2874_p0 = scmp.lt.u32.totalorder %s2870_s4, %s3506_s8 }
0x1e1e   :  { %p2876_p1 = pnand %p2874_p0, %p2871_p13 }
0x1e20   :  { %2879 = shalt.err (!%p2876_p1)
}
0x1e21   :  { %s2918_s26 = smov 2   ;;  %v2198_v59 = vld [vmem:[%s3504_s6] ss:$0 sm:$0xff]  ;;  %s2919_s29 = smov [#allocation5]   ;;  %vm2096_vm8 = vcmask 25600  }
0x1e22   :  { %2125 = dma.vmem_to_hbm [thread:$0]  %s2120_s5, 64, %s3506_s8, [#allocation7], %s2912_s21, %s2912_s21, %s2918_s26  }
0x1e23   :  { %s2110_s30 = sshll.u32 %s2919_s29, 4  ;;  %s2111_s30 = int_to_ptr.vmem [resolvable:$true] %s2110_s30 }
0x1e24   :  { %s2880_s1 = scalar_lea.vmem %s2111_s30, 32  ;;  %p2885_p3 = scmp.lt.s32.totalorder %s2111_s30, %s2111_s30 }
0x1e25   :  { %p2881_p2 = scmp.ne.s32.totalorder %s2111_s30, %s2880_s1  ;;  %p2886_p4 = scmp.lt.s32.totalorder %s2880_s1, %s2880_s1 }
0x1e27   :  { %p2887_p5 = por %p2886_p4, %p2885_p3 }
0x1e29   :  { %p2888_p6 = pnand %p2887_p5, %p2881_p2 }
0x1eec   :  { %v2092_v60 = vpop.f32.mrb[18].mxu0 }
0x1eed   :  { %v2093_v62 = vadd.f32 %v2198_v59, %v2092_v60  ;;  %v2474_v3 = vpop.f32.mrb[19].mxu0 }
0x1eef   :  { %2097 = vst.msk [vmem:[#allocation5] sm:$0x3] %vm2096_vm8, %v2093_v62 }
0x1ef0   :  { %2891 = shalt.err (!%p2888_p6)
}
0x1ef1   :  { %s2892_s3 = scalar_lea.hbm %s3505_s7, 32 }
0x1ef2   :  { %p2893_p7 = scmp.ne.s32.totalorder %s3505_s7, %s2892_s3  ;;  %p2896_p8 = scmp.lt.u32.totalorder %s2892_s3, %s3505_s7 }
0x1ef4   :  { %p2898_p9 = pnand %p2896_p8, %p2893_p7 }
0x1ef6   :  { %2901 = shalt.err (!%p2898_p9)
}
0x1ef7   :  { %2113 = dma.vmem_to_hbm [thread:$0]  %s2111_s30, 32, %s3505_s7, [#allocation4]  }
0x1ef8   :  { %2904 = dma.done.wait [#allocation4], 32  }
0x1ef9   :  { %2905 = vsyncadd [#allocation4], 4294967264 }
0x1efa   :  { %2906 = dma.done.wait [#allocation7], 64  }
0x1efb   :  { %2907 = vsyncadd [#allocation7], 4294967232 }
0x1efc   :  { %2132 = vsyncpa [#allocation3], 1 }
0x1efd   :  { %2133 = vsyncpa [#allocation4], 1 }
0x1efe   :  { %2134 = vsyncpa [#allocation7], 1 }

</bundles_post_ra>
